<compile_context>
chip_gen: v7x
topology: tpu7x:2x2x1
jax: 0.10.0
libtpu: 0.0.40
codegen_flags: <defaults>
</compile_context>

<pallas_src>
import jax
import jax.numpy as jnp
from jax import lax
from jax.experimental import pallas as pl
from jax.experimental.pallas import tpu as pltpu


def _round_up(x, m):
    return ((x + m - 1) // m) * m


def decoder_kernel(src_ref, emb_ref, wih_t_ref, whh_t_ref, b_ref,
                   wout_t_ref, bout_ref, h0_ref, c0_ref,
                   prob_ref, hn_ref, cn_ref,
                   h_s, c_s, xg_ref, hs_ref):
    """Fused embedding matmul + single-layer LSTM + hoisted output projection.

    Block shapes seen by the kernel (Bc = padded batch block, Hp/Vp padded):
      src_ref   : (Tt*Bc, V)     time-major rows, row = t*Bc + b
      emb_ref   : (V, E)         embedding matrix (resident)
      wih_t_ref : (E, 4*Hp)      W_ih^T, gate order i,f,g,o, each gate padded
      whh_t_ref : (Hp, 4*Hp)     W_hh^T (padded)
      b_ref     : (1, 4*Hp)      b_ih + b_hh (padded)
      wout_t_ref: (Hp, Vp)       output Linear weight^T (padded)
      bout_ref  : (1, Vp)        output Linear bias (padded)
      h0/c0_ref : (Bc, Hp)       initial state for this batch group
      prob_ref  : (Tt*Bc, Vp)    logits for this chunk (lane-dense)
      hn/cn_ref : (Bc, Hp)       final state (written on last time chunk)
      h_s, c_s  : (Bc, Hp) f32   carried LSTM state across time chunks
      xg_ref    : (Tt*Bc, 4*Hp)  f32 scratch, per-chunk input projections
      hs_ref    : (Tt*Bc, Hp)    f32 scratch, per-chunk hidden states
    """
    tci = pl.program_id(1)                      # time-chunk index (serial)
    Bc, Hp = h0_ref.shape
    Tt = src_ref.shape[0] // Bc

    # ---- initialise the carried LSTM state at the first time chunk ----
    @pl.when(tci == 0)
    def _init():
        h_s[...] = h0_ref[...].astype(jnp.float32)
        c_s[...] = c0_ref[...].astype(jnp.float32)

    # ---- prologue: dense 2-D MXU matmuls over the whole chunk ----
    emb2 = jnp.dot(src_ref[...], emb_ref[...],
                   preferred_element_type=jnp.float32)              # (Tt*Bc, E)
    xg_ref[...] = (jnp.dot(emb2, wih_t_ref[...],
                           preferred_element_type=jnp.float32)
                   + b_ref[...])                                    # (Tt*Bc, 4Hp)

    whh_t = whh_t_ref[...]                                          # (Hp, 4Hp)

    # ---- serial recurrence: one recurrent matmul per step, no stores to HBM,
    #      gate slices are 128-lane aligned, loop fully unrolled ----
    def step(t, carry):
        h, c = carry
        r0 = pl.multiple_of(t * Bc, 8)
        gates = xg_ref[pl.ds(r0, Bc), :] + jnp.dot(
            h, whh_t, preferred_element_type=jnp.float32)           # (Bc, 4Hp)
        i = jax.nn.sigmoid(gates[:, 0 * Hp:1 * Hp])
        f = jax.nn.sigmoid(gates[:, 1 * Hp:2 * Hp])
        g = jnp.tanh(gates[:, 2 * Hp:3 * Hp])
        o = jax.nn.sigmoid(gates[:, 3 * Hp:4 * Hp])
        c_new = f * c + i * g
        h_new = o * jnp.tanh(c_new)
        hs_ref[pl.ds(r0, Bc), :] = h_new
        return h_new, c_new

    h_fin, c_fin = lax.fori_loop(0, Tt, step, (h_s[...], c_s[...]),
                                 unroll=True)
    h_s[...] = h_fin
    c_s[...] = c_fin

    # ---- epilogue: one lane-dense output projection for the whole chunk ----
    prob_ref[...] = (jnp.dot(hs_ref[...], wout_t_ref[...],
                             preferred_element_type=jnp.float32)
                     + bout_ref[...]).astype(prob_ref.dtype)

    @pl.when(tci == pl.num_programs(1) - 1)
    def _final():
        hn_ref[...] = h_fin.astype(hn_ref.dtype)
        cn_ref[...] = c_fin.astype(cn_ref.dtype)


def decoder_forward(src, state, params, *, time_block=None):
    """PyTorch-equivalent forward. src: (B,T,V); state: ((1,B,H),(1,B,H))."""
    h0, c0 = state
    emb_mat = params['embedding_matrix']              # (V, E)
    w_ih = params['w_ih']                             # (4H, E)
    w_hh = params['w_hh']                             # (4H, H)
    b_ih, b_hh = params['b_ih'], params['b_hh']       # (4H,)
    w_out = params['w_out']                           # (Vout, H)
    b_out = params['b_out']                           # (Vout,)

    B, T, Vin = src.shape
    E = emb_mat.shape[1]
    H = w_hh.shape[1]
    Vout = w_out.shape[0]

    Bc = 8                                            # one sublane tile per batch group
    Bp = _round_up(B, Bc)
    Bg = Bp // Bc                                     # batch groups -> parallel grid axis
    Hp = _round_up(H, 128)                            # lane-aligned gate slices
    Vp = _round_up(Vout, 128)                         # lane-dense output stores

    if time_block is None:
        time_block = T
        for cand in (64, 32, 16, 8, 4):
            if T % cand == 0:
                time_block = cand
                break
    Tt = time_block
    assert T % Tt == 0, "time_block must divide T"

    # --- glue: time-major layout, batch padded to the 8-sublane tile, grouped ---
    src_tm = jnp.transpose(src, (1, 0, 2))                          # (T, B, V)
    src_tm = jnp.pad(src_tm, ((0, 0), (0, Bp - B), (0, 0)))          # (T, Bp, V)
    src_tm = (src_tm.reshape(T, Bg, Bc, Vin)
              .transpose(1, 0, 2, 3)
              .reshape(Bg, T * Bc, Vin))                             # row = t*Bc + b

    def prep_state(s):
        s = jnp.pad(s[0], ((0, Bp - B), (0, Hp - H)))                # (Bp, Hp)
        return s.reshape(Bg, Bc, Hp)

    h0_g = prep_state(h0)
    c0_g = prep_state(c0)

    # --- pad each gate block so gate slices are 128-lane-tile aligned ---
    def pad_gate_cols(w_t):                                          # (in, 4H) -> (in, 4*Hp)
        return jnp.concatenate(
            [jnp.pad(w_t[:, k * H:(k + 1) * H], ((0, 0), (0, Hp - H)))
             for k in range(4)], axis=1)

    wih_t = pad_gate_cols(w_ih.T)                                    # (E, 4Hp)
    whh_t = jnp.pad(pad_gate_cols(w_hh.T), ((0, Hp - H), (0, 0)))    # (Hp, 4Hp)
    bias = b_ih + b_hh
    bias = jnp.concatenate(
        [jnp.pad(bias[k * H:(k + 1) * H], (0, Hp - H)) for k in range(4)])[None, :]
    wout_t = jnp.pad(w_out.T, ((0, Hp - H), (0, Vp - Vout)))         # (Hp, Vp)
    bout = jnp.pad(b_out, (0, Vp - Vout))[None, :]                   # (1, Vp)

    # TODO(synk): if `src` is truly one-hot, replace the dense embedding matmul
    # with a scalar-prefetched row gather of the embedding matrix.

    def resident(shape):
        return pl.BlockSpec(shape, lambda bi, ti: (0,) * len(shape))

    in_specs = [
        pl.BlockSpec((None, Tt * Bc, Vin), lambda bi, ti: (bi, ti, 0)),  # src (streamed)
        resident((Vin, E)),                                              # embedding
        resident((E, 4 * Hp)),                                           # W_ih^T
        resident((Hp, 4 * Hp)),                                          # W_hh^T
        resident((1, 4 * Hp)),                                           # bias
        resident((Hp, Vp)),                                              # W_out^T
        resident((1, Vp)),                                               # b_out
        pl.BlockSpec((None, Bc, Hp), lambda bi, ti: (bi, 0, 0)),         # h0
        pl.BlockSpec((None, Bc, Hp), lambda bi, ti: (bi, 0, 0)),         # c0
    ]
    out_specs = (
        pl.BlockSpec((None, Tt * Bc, Vp), lambda bi, ti: (bi, ti, 0)),   # prob (streamed)
        pl.BlockSpec((None, Bc, Hp), lambda bi, ti: (bi, 0, 0)),         # h_n
        pl.BlockSpec((None, Bc, Hp), lambda bi, ti: (bi, 0, 0)),         # c_n
    )
    out_shape = (
        jax.ShapeDtypeStruct((Bg, T * Bc, Vp), src.dtype),
        jax.ShapeDtypeStruct((Bg, Bc, Hp), src.dtype),
        jax.ShapeDtypeStruct((Bg, Bc, Hp), src.dtype),
    )
    scratch_shapes = [
        pltpu.VMEM((Bc, Hp), jnp.float32),           # carried h (f32)
        pltpu.VMEM((Bc, Hp), jnp.float32),           # carried c (f32)
        pltpu.VMEM((Tt * Bc, 4 * Hp), jnp.float32),  # per-chunk input projections
        pltpu.VMEM((Tt * Bc, Hp), jnp.float32),      # per-chunk hidden states
    ]

    prob_g, hn_g, cn_g = pl.pallas_call(
        decoder_kernel,
        out_shape=out_shape,
        grid_spec=pltpu.PrefetchScalarGridSpec(
            num_scalar_prefetch=0,
            grid=(Bg, T // Tt),
            in_specs=in_specs,
            out_specs=out_specs,
            scratch_shapes=scratch_shapes),
        compiler_params=pltpu.CompilerParams(
            dimension_semantics=("parallel", "arbitrary"),
            vmem_limit_bytes=64 * 1024 * 1024),
    )(src_tm, emb_mat, wih_t, whh_t, bias, wout_t, bout, h0_g, c0_g)

    # --- glue: undo padding / grouping, back to batch_first ---
    prob = (prob_g.reshape(Bg, T, Bc, Vp)
            .transpose(1, 0, 2, 3)
            .reshape(T, Bp, Vp)[:, :B, :Vout])
    prob = jnp.transpose(prob, (1, 0, 2))                            # (B, T, Vout)
    hn = hn_g.reshape(Bp, Hp)[:B, :H][None]
    cn = cn_g.reshape(Bp, Hp)[:B, :H][None]
    return prob, (hn, cn)


def decoder_reference(src, state, params):
    """Pure-JAX reference mirroring torch semantics (for verification)."""
    emb = src @ params['embedding_matrix']
    h, c = state[0][0], state[1][0]
    w_ih, w_hh = params['w_ih'], params['w_hh']
    b = params['b_ih'] + params['b_hh']
    H = w_hh.shape[1]
    outs = []
    for t in range(src.shape[1]):
        g = emb[:, t] @ w_ih.T + h @ w_hh.T + b
        i = jax.nn.sigmoid(g[:, :H])
        f = jax.nn.sigmoid(g[:, H:2 * H])
        gg = jnp.tanh(g[:, 2 * H:3 * H])
        o = jax.nn.sigmoid(g[:, 3 * H:])
        c = f * c + i * gg
        h = o * jnp.tanh(c)
        outs.append(h)
    out = jnp.stack(outs, axis=1)
    prob = out @ params['w_out'].T + params['b_out']
    return prob, (h[None], c[None])


if __name__ == "__main__":
    # Small shapes consistent with the module's forward pass.
    B, T = 2, 8
    vocab_size = 32   # input one-hot width and output logits width
    emb_size = 16
    hidden_size = 32

    key = jax.random.PRNGKey(0)
    ks = jax.random.split(key, 10)

    params = {
        'embedding_matrix': 0.1 * jax.random.normal(ks[0], (vocab_size, emb_size), jnp.float32),
        'w_ih':  0.1 * jax.random.normal(ks[1], (4 * hidden_size, emb_size), jnp.float32),
        'w_hh':  0.1 * jax.random.normal(ks[2], (4 * hidden_size, hidden_size), jnp.float32),
        'b_ih':  0.1 * jax.random.normal(ks[3], (4 * hidden_size,), jnp.float32),
        'b_hh':  0.1 * jax.random.normal(ks[4], (4 * hidden_size,), jnp.float32),
        'w_out': 0.1 * jax.random.normal(ks[5], (vocab_size, hidden_size), jnp.float32),
        'b_out': 0.1 * jax.random.normal(ks[6], (vocab_size,), jnp.float32),
    }

    # src: soft distribution over vocab (any real tensor works for src.matmul).
    src = jax.random.normal(ks[7], (B, T, vocab_size), jnp.float32)
    h0 = 0.1 * jax.random.normal(ks[8], (1, B, hidden_size), jnp.float32)
    c0 = 0.1 * jax.random.normal(ks[9], (1, B, hidden_size), jnp.float32)

    # time_block=4 -> grid=(1, 2): exercises the streamed time-chunk carry.
    prob, (h_n, c_n) = decoder_forward(src, (h0, c0), params, time_block=4)
    jax.block_until_ready((prob, h_n, c_n))

    # Verify against the pure-JAX reference.
    prob_ref, (h_ref, c_ref) = decoder_reference(src, (h0, c0), params)
    assert prob.shape == (B, T, vocab_size)
    assert h_n.shape == (1, B, hidden_size) and c_n.shape == (1, B, hidden_size)
    assert jnp.allclose(prob, prob_ref, atol=1e-3, rtol=1e-3)
    assert jnp.allclose(h_n, h_ref, atol=1e-3, rtol=1e-3)
    assert jnp.allclose(c_n, c_ref, atol=1e-3, rtol=1e-3)

    print("KERNEL_OK")
</pallas_src>

<mosaic_0001>
module attributes {stable_mosaic.version = 11 : i64} {
  func.func @decoder_kernel(%arg0: i32, %arg1: i32, %arg2: memref<1x32x32xf32, #tpu.memory_space<vmem>>, %arg3: memref<32x16xf32, #tpu.memory_space<vmem>>, %arg4: memref<16x512xf32, #tpu.memory_space<vmem>>, %arg5: memref<128x512xf32, #tpu.memory_space<vmem>>, %arg6: memref<1x512xf32, #tpu.memory_space<vmem>>, %arg7: memref<128x128xf32, #tpu.memory_space<vmem>>, %arg8: memref<1x128xf32, #tpu.memory_space<vmem>>, %arg9: memref<1x8x128xf32, #tpu.memory_space<vmem>>, %arg10: memref<1x8x128xf32, #tpu.memory_space<vmem>>, %arg11: memref<1x32x128xf32, #tpu.memory_space<vmem>>, %arg12: memref<1x8x128xf32, #tpu.memory_space<vmem>>, %arg13: memref<1x8x128xf32, #tpu.memory_space<vmem>>, %arg14: memref<8x128xf32, #tpu.memory_space<vmem>>, %arg15: memref<8x128xf32, #tpu.memory_space<vmem>>, %arg16: memref<32x512xf32, #tpu.memory_space<vmem>>, %arg17: memref<32x128xf32, #tpu.memory_space<vmem>>) attributes {dimension_semantics = [#tpu.dimension_semantics<parallel>, #tpu.dimension_semantics<arbitrary>], iteration_bounds = array<i64: 1, 2>, scalar_prefetch = 0 : i64, scratch_operands = 4 : i64, tpu.core_type = #tpu.core_type<tc>, window_params = [{transform_indices = @transform_0, window_bounds = array<i64: 1, 32, 32>}, {pipeline_mode = #tpu.pipeline_mode<synchronous>, transform_indices = @transform_1, window_bounds = array<i64: 32, 16>}, {pipeline_mode = #tpu.pipeline_mode<synchronous>, transform_indices = @transform_2, window_bounds = array<i64: 16, 512>}, {pipeline_mode = #tpu.pipeline_mode<synchronous>, transform_indices = @transform_3, window_bounds = array<i64: 128, 512>}, {pipeline_mode = #tpu.pipeline_mode<synchronous>, transform_indices = @transform_4, window_bounds = array<i64: 1, 512>}, {pipeline_mode = #tpu.pipeline_mode<synchronous>, transform_indices = @transform_5, window_bounds = array<i64: 128, 128>}, {pipeline_mode = #tpu.pipeline_mode<synchronous>, transform_indices = @transform_6, window_bounds = array<i64: 1, 128>}, {transform_indices = @transform_7, window_bounds = array<i64: 1, 8, 128>}, {transform_indices = @transform_8, window_bounds = array<i64: 1, 8, 128>}, {transform_indices = @transform_9, window_bounds = array<i64: 1, 32, 128>}, {transform_indices = @transform_10, window_bounds = array<i64: 1, 8, 128>}, {transform_indices = @transform_11, window_bounds = array<i64: 1, 8, 128>}]} {
    %c0_i32 = arith.constant 0 : i32
    %0 = arith.cmpi eq, %arg1, %c0_i32 : i32
    %1 = arith.extui %0 : i1 to i32
    %c0_i32_0 = arith.constant 0 : i32
    %2 = arith.cmpi ne, %1, %c0_i32_0 : i32
    scf.if %2 {
      %c0_62 = arith.constant 0 : index
      %c0_63 = arith.constant 0 : index
      %c0_64 = arith.constant 0 : index
      %162 = vector.load %arg9[%c0_62, %c0_63, %c0_64] : memref<1x8x128xf32, #tpu.memory_space<vmem>>, vector<1x8x128xf32>
      %163 = vector.shape_cast %162 : vector<1x8x128xf32> to vector<8x128xf32>
      %c0_65 = arith.constant 0 : index
      %c0_66 = arith.constant 0 : index
      %164 = vector.load %arg14[%c0_65, %c0_66] : memref<8x128xf32, #tpu.memory_space<vmem>>, vector<8x128xf32>
      tpu.vector_store %arg14[%c0_65, %c0_66], %163 {strides = array<i32>} : memref<8x128xf32, #tpu.memory_space<vmem>>, vector<8x128xf32>,
      %c0_67 = arith.constant 0 : index
      %c0_68 = arith.constant 0 : index
      %c0_69 = arith.constant 0 : index
      %165 = vector.load %arg10[%c0_67, %c0_68, %c0_69] : memref<1x8x128xf32, #tpu.memory_space<vmem>>, vector<1x8x128xf32>
      %166 = vector.shape_cast %165 : vector<1x8x128xf32> to vector<8x128xf32>
      %c0_70 = arith.constant 0 : index
      %c0_71 = arith.constant 0 : index
      %167 = vector.load %arg15[%c0_70, %c0_71] : memref<8x128xf32, #tpu.memory_space<vmem>>, vector<8x128xf32>
      tpu.vector_store %arg15[%c0_70, %c0_71], %166 {strides = array<i32>} : memref<8x128xf32, #tpu.memory_space<vmem>>, vector<8x128xf32>,
    } else {
    }
    %c0 = arith.constant 0 : index
    %c0_1 = arith.constant 0 : index
    %c0_2 = arith.constant 0 : index
    %3 = vector.load %arg2[%c0, %c0_1, %c0_2] : memref<1x32x32xf32, #tpu.memory_space<vmem>>, vector<1x32x32xf32>
    %4 = vector.shape_cast %3 : vector<1x32x32xf32> to vector<32x32xf32>
    %c0_3 = arith.constant 0 : index
    %c0_4 = arith.constant 0 : index
    %5 = vector.load %arg3[%c0_3, %c0_4] : memref<32x16xf32, #tpu.memory_space<vmem>>, vector<32x16xf32>
    %cst = arith.constant dense<0.000000e+00> : vector<32x16xf32>
    %6 = tpu.matmul %4, %5, %cst {dimension_numbers = #tpu.dot_dimension_numbers<[1], [0], [0], [1], [0, 0, 1, 1], [], []>} : vector<32x32xf32>, vector<32x16xf32>, vector<32x16xf32> -> vector<32x16xf32>
    %c0_5 = arith.constant 0 : index
    %c0_6 = arith.constant 0 : index
    %7 = vector.load %arg4[%c0_5, %c0_6] : memref<16x512xf32, #tpu.memory_space<vmem>>, vector<16x512xf32>
    %cst_7 = arith.constant dense<0.000000e+00> : vector<32x512xf32>
    %8 = tpu.matmul %6, %7, %cst_7 {dimension_numbers = #tpu.dot_dimension_numbers<[1], [0], [0], [1], [0, 0, 1, 1], [], []>} : vector<32x16xf32>, vector<16x512xf32>, vector<32x512xf32> -> vector<32x512xf32>
    %c0_8 = arith.constant 0 : index
    %c0_9 = arith.constant 0 : index
    %9 = vector.load %arg6[%c0_8, %c0_9] : memref<1x512xf32, #tpu.memory_space<vmem>>, vector<1x512xf32>
    %10 = vector.broadcast %9 : vector<1x512xf32> to vector<32x512xf32>
    %11 = arith.addf %8, %10 : vector<32x512xf32>
    %c0_10 = arith.constant 0 : index
    %c0_11 = arith.constant 0 : index
    %12 = vector.load %arg16[%c0_10, %c0_11] : memref<32x512xf32, #tpu.memory_space<vmem>>, vector<32x512xf32>
    tpu.vector_store %arg16[%c0_10, %c0_11], %11 {strides = array<i32>} : memref<32x512xf32, #tpu.memory_space<vmem>>, vector<32x512xf32>,
    %c0_12 = arith.constant 0 : index
    %c0_13 = arith.constant 0 : index
    %13 = vector.load %arg5[%c0_12, %c0_13] : memref<128x512xf32, #tpu.memory_space<vmem>>, vector<128x512xf32>
    %c0_14 = arith.constant 0 : index
    %c0_15 = arith.constant 0 : index
    %14 = vector.load %arg14[%c0_14, %c0_15] : memref<8x128xf32, #tpu.memory_space<vmem>>, vector<8x128xf32>
    %c0_16 = arith.constant 0 : index
    %c0_17 = arith.constant 0 : index
    %15 = vector.load %arg15[%c0_16, %c0_17] : memref<8x128xf32, #tpu.memory_space<vmem>>, vector<8x128xf32>
    %c0_i32_18 = arith.constant 0 : i32
    %c8_i32 = arith.constant 8 : i32
    %16 = arith.muli %c0_i32_18, %c8_i32 : i32
    %17 = tpu.assume_multiple %16, 8 : i32
    %18 = arith.index_cast %17 : i32 to index
    %c0_19 = arith.constant 0 : index
    %19 = vector.load %arg16[%18, %c0_19] : memref<32x512xf32, #tpu.memory_space<vmem>>, vector<8x512xf32>
    %cst_20 = arith.constant dense<0.000000e+00> : vector<8x512xf32>
    %20 = tpu.matmul %14, %13, %cst_20 {dimension_numbers = #tpu.dot_dimension_numbers<[1], [0], [0], [1], [0, 0, 1, 1], [], []>} : vector<8x128xf32>, vector<128x512xf32>, vector<8x512xf32> -> vector<8x512xf32>
    %21 = arith.addf %19, %20 : vector<8x512xf32>
    %22 = vector.extract_strided_slice %21 {offsets = [0, 0], sizes = [8, 128], strides = [1, 1]} : vector<8x512xf32> to vector<8x128xf32>
    %23 = arith.negf %22 : vector<8x128xf32>
    %24 = math.exp %23 : vector<8x128xf32>
    %cst_21 = arith.constant 1.000000e+00 : f32
    %25 = vector.broadcast %cst_21 : f32 to vector<8x128xf32>
    %26 = arith.addf %25, %24 : vector<8x128xf32>
    %27 = arith.divf %25, %26 : vector<8x128xf32>
    %28 = vector.extract_strided_slice %21 {offsets = [0, 128], sizes = [8, 128], strides = [1, 1]} : vector<8x512xf32> to vector<8x128xf32>
    %29 = arith.negf %28 : vector<8x128xf32>
    %30 = math.exp %29 : vector<8x128xf32>
    %cst_22 = arith.constant 1.000000e+00 : f32
    %31 = vector.broadcast %cst_22 : f32 to vector<8x128xf32>
    %32 = arith.addf %31, %30 : vector<8x128xf32>
    %33 = arith.divf %31, %32 : vector<8x128xf32>
    %34 = vector.extract_strided_slice %21 {offsets = [0, 256], sizes = [8, 128], strides = [1, 1]} : vector<8x512xf32> to vector<8x128xf32>
    %35 = math.tanh %34 : vector<8x128xf32>
    %36 = vector.extract_strided_slice %21 {offsets = [0, 384], sizes = [8, 128], strides = [1, 1]} : vector<8x512xf32> to vector<8x128xf32>
    %37 = arith.negf %36 : vector<8x128xf32>
    %38 = math.exp %37 : vector<8x128xf32>
    %cst_23 = arith.constant 1.000000e+00 : f32
    %39 = vector.broadcast %cst_23 : f32 to vector<8x128xf32>
    %40 = arith.addf %39, %38 : vector<8x128xf32>
    %41 = arith.divf %39, %40 : vector<8x128xf32>
    %42 = arith.mulf %33, %15 : vector<8x128xf32>
    %43 = arith.mulf %27, %35 : vector<8x128xf32>
    %44 = arith.addf %42, %43 : vector<8x128xf32>
    %45 = math.tanh %44 : vector<8x128xf32>
    %46 = arith.mulf %41, %45 : vector<8x128xf32>
    %47 = arith.index_cast %17 : i32 to index
    %c0_24 = arith.constant 0 : index
    %48 = vector.load %arg17[%47, %c0_24] : memref<32x128xf32, #tpu.memory_space<vmem>>, vector<8x128xf32>
    tpu.vector_store %arg17[%47, %c0_24], %46 {strides = array<i32>} : memref<32x128xf32, #tpu.memory_space<vmem>>, vector<8x128xf32>,
    %c1_i32 = arith.constant 1 : i32
    %c8_i32_25 = arith.constant 8 : i32
    %49 = arith.muli %c1_i32, %c8_i32_25 : i32
    %50 = tpu.assume_multiple %49, 8 : i32
    %51 = arith.index_cast %50 : i32 to index
    %c0_26 = arith.constant 0 : index
    %52 = vector.load %arg16[%51, %c0_26] : memref<32x512xf32, #tpu.memory_space<vmem>>, vector<8x512xf32>
    %cst_27 = arith.constant dense<0.000000e+00> : vector<8x512xf32>
    %53 = tpu.matmul %46, %13, %cst_27 {dimension_numbers = #tpu.dot_dimension_numbers<[1], [0], [0], [1], [0, 0, 1, 1], [], []>} : vector<8x128xf32>, vector<128x512xf32>, vector<8x512xf32> -> vector<8x512xf32>
    %54 = arith.addf %52, %53 : vector<8x512xf32>
    %55 = vector.extract_strided_slice %54 {offsets = [0, 0], sizes = [8, 128], strides = [1, 1]} : vector<8x512xf32> to vector<8x128xf32>
    %56 = arith.negf %55 : vector<8x128xf32>
    %57 = math.exp %56 : vector<8x128xf32>
    %cst_28 = arith.constant 1.000000e+00 : f32
    %58 = vector.broadcast %cst_28 : f32 to vector<8x128xf32>
    %59 = arith.addf %58, %57 : vector<8x128xf32>
    %60 = arith.divf %58, %59 : vector<8x128xf32>
    %61 = vector.extract_strided_slice %54 {offsets = [0, 128], sizes = [8, 128], strides = [1, 1]} : vector<8x512xf32> to vector<8x128xf32>
    %62 = arith.negf %61 : vector<8x128xf32>
    %63 = math.exp %62 : vector<8x128xf32>
    %cst_29 = arith.constant 1.000000e+00 : f32
    %64 = vector.broadcast %cst_29 : f32 to vector<8x128xf32>
    %65 = arith.addf %64, %63 : vector<8x128xf32>
    %66 = arith.divf %64, %65 : vector<8x128xf32>
    %67 = vector.extract_strided_slice %54 {offsets = [0, 256], sizes = [8, 128], strides = [1, 1]} : vector<8x512xf32> to vector<8x128xf32>
    %68 = math.tanh %67 : vector<8x128xf32>
    %69 = vector.extract_strided_slice %54 {offsets = [0, 384], sizes = [8, 128], strides = [1, 1]} : vector<8x512xf32> to vector<8x128xf32>
    %70 = arith.negf %69 : vector<8x128xf32>
    %71 = math.exp %70 : vector<8x128xf32>
    %cst_30 = arith.constant 1.000000e+00 : f32
    %72 = vector.broadcast %cst_30 : f32 to vector<8x128xf32>
    %73 = arith.addf %72, %71 : vector<8x128xf32>
    %74 = arith.divf %72, %73 : vector<8x128xf32>
    %75 = arith.mulf %66, %44 : vector<8x128xf32>
    %76 = arith.mulf %60, %68 : vector<8x128xf32>
    %77 = arith.addf %75, %76 : vector<8x128xf32>
    %78 = math.tanh %77 : vector<8x128xf32>
    %79 = arith.mulf %74, %78 : vector<8x128xf32>
    %80 = arith.index_cast %50 : i32 to index
    %c0_31 = arith.constant 0 : index
    %81 = vector.load %arg17[%80, %c0_31] : memref<32x128xf32, #tpu.memory_space<vmem>>, vector<8x128xf32>
    tpu.vector_store %arg17[%80, %c0_31], %79 {strides = array<i32>} : memref<32x128xf32, #tpu.memory_space<vmem>>, vector<8x128xf32>,
    %c2_i32 = arith.constant 2 : i32
    %c8_i32_32 = arith.constant 8 : i32
    %82 = arith.muli %c2_i32, %c8_i32_32 : i32
    %83 = tpu.assume_multiple %82, 8 : i32
    %84 = arith.index_cast %83 : i32 to index
    %c0_33 = arith.constant 0 : index
    %85 = vector.load %arg16[%84, %c0_33] : memref<32x512xf32, #tpu.memory_space<vmem>>, vector<8x512xf32>
    %cst_34 = arith.constant dense<0.000000e+00> : vector<8x512xf32>
    %86 = tpu.matmul %79, %13, %cst_34 {dimension_numbers = #tpu.dot_dimension_numbers<[1], [0], [0], [1], [0, 0, 1, 1], [], []>} : vector<8x128xf32>, vector<128x512xf32>, vector<8x512xf32> -> vector<8x512xf32>
    %87 = arith.addf %85, %86 : vector<8x512xf32>
    %88 = vector.extract_strided_slice %87 {offsets = [0, 0], sizes = [8, 128], strides = [1, 1]} : vector<8x512xf32> to vector<8x128xf32>
    %89 = arith.negf %88 : vector<8x128xf32>
    %90 = math.exp %89 : vector<8x128xf32>
    %cst_35 = arith.constant 1.000000e+00 : f32
    %91 = vector.broadcast %cst_35 : f32 to vector<8x128xf32>
    %92 = arith.addf %91, %90 : vector<8x128xf32>
    %93 = arith.divf %91, %92 : vector<8x128xf32>
    %94 = vector.extract_strided_slice %87 {offsets = [0, 128], sizes = [8, 128], strides = [1, 1]} : vector<8x512xf32> to vector<8x128xf32>
    %95 = arith.negf %94 : vector<8x128xf32>
    %96 = math.exp %95 : vector<8x128xf32>
    %cst_36 = arith.constant 1.000000e+00 : f32
    %97 = vector.broadcast %cst_36 : f32 to vector<8x128xf32>
    %98 = arith.addf %97, %96 : vector<8x128xf32>
    %99 = arith.divf %97, %98 : vector<8x128xf32>
    %100 = vector.extract_strided_slice %87 {offsets = [0, 256], sizes = [8, 128], strides = [1, 1]} : vector<8x512xf32> to vector<8x128xf32>
    %101 = math.tanh %100 : vector<8x128xf32>
    %102 = vector.extract_strided_slice %87 {offsets = [0, 384], sizes = [8, 128], strides = [1, 1]} : vector<8x512xf32> to vector<8x128xf32>
    %103 = arith.negf %102 : vector<8x128xf32>
    %104 = math.exp %103 : vector<8x128xf32>
    %cst_37 = arith.constant 1.000000e+00 : f32
    %105 = vector.broadcast %cst_37 : f32 to vector<8x128xf32>
    %106 = arith.addf %105, %104 : vector<8x128xf32>
    %107 = arith.divf %105, %106 : vector<8x128xf32>
    %108 = arith.mulf %99, %77 : vector<8x128xf32>
    %109 = arith.mulf %93, %101 : vector<8x128xf32>
    %110 = arith.addf %108, %109 : vector<8x128xf32>
    %111 = math.tanh %110 : vector<8x128xf32>
    %112 = arith.mulf %107, %111 : vector<8x128xf32>
    %113 = arith.index_cast %83 : i32 to index
    %c0_38 = arith.constant 0 : index
    %114 = vector.load %arg17[%113, %c0_38] : memref<32x128xf32, #tpu.memory_space<vmem>>, vector<8x128xf32>
    tpu.vector_store %arg17[%113, %c0_38], %112 {strides = array<i32>} : memref<32x128xf32, #tpu.memory_space<vmem>>, vector<8x128xf32>,
    %c3_i32 = arith.constant 3 : i32
    %c8_i32_39 = arith.constant 8 : i32
    %115 = arith.muli %c3_i32, %c8_i32_39 : i32
    %116 = tpu.assume_multiple %115, 8 : i32
    %117 = arith.index_cast %116 : i32 to index
    %c0_40 = arith.constant 0 : index
    %118 = vector.load %arg16[%117, %c0_40] : memref<32x512xf32, #tpu.memory_space<vmem>>, vector<8x512xf32>
    %cst_41 = arith.constant dense<0.000000e+00> : vector<8x512xf32>
    %119 = tpu.matmul %112, %13, %cst_41 {dimension_numbers = #tpu.dot_dimension_numbers<[1], [0], [0], [1], [0, 0, 1, 1], [], []>} : vector<8x128xf32>, vector<128x512xf32>, vector<8x512xf32> -> vector<8x512xf32>
    %120 = arith.addf %118, %119 : vector<8x512xf32>
    %121 = vector.extract_strided_slice %120 {offsets = [0, 0], sizes = [8, 128], strides = [1, 1]} : vector<8x512xf32> to vector<8x128xf32>
    %122 = arith.negf %121 : vector<8x128xf32>
    %123 = math.exp %122 : vector<8x128xf32>
    %cst_42 = arith.constant 1.000000e+00 : f32
    %124 = vector.broadcast %cst_42 : f32 to vector<8x128xf32>
    %125 = arith.addf %124, %123 : vector<8x128xf32>
    %126 = arith.divf %124, %125 : vector<8x128xf32>
    %127 = vector.extract_strided_slice %120 {offsets = [0, 128], sizes = [8, 128], strides = [1, 1]} : vector<8x512xf32> to vector<8x128xf32>
    %128 = arith.negf %127 : vector<8x128xf32>
    %129 = math.exp %128 : vector<8x128xf32>
    %cst_43 = arith.constant 1.000000e+00 : f32
    %130 = vector.broadcast %cst_43 : f32 to vector<8x128xf32>
    %131 = arith.addf %130, %129 : vector<8x128xf32>
    %132 = arith.divf %130, %131 : vector<8x128xf32>
    %133 = vector.extract_strided_slice %120 {offsets = [0, 256], sizes = [8, 128], strides = [1, 1]} : vector<8x512xf32> to vector<8x128xf32>
    %134 = math.tanh %133 : vector<8x128xf32>
    %135 = vector.extract_strided_slice %120 {offsets = [0, 384], sizes = [8, 128], strides = [1, 1]} : vector<8x512xf32> to vector<8x128xf32>
    %136 = arith.negf %135 : vector<8x128xf32>
    %137 = math.exp %136 : vector<8x128xf32>
    %cst_44 = arith.constant 1.000000e+00 : f32
    %138 = vector.broadcast %cst_44 : f32 to vector<8x128xf32>
    %139 = arith.addf %138, %137 : vector<8x128xf32>
    %140 = arith.divf %138, %139 : vector<8x128xf32>
    %141 = arith.mulf %132, %110 : vector<8x128xf32>
    %142 = arith.mulf %126, %134 : vector<8x128xf32>
    %143 = arith.addf %141, %142 : vector<8x128xf32>
    %144 = math.tanh %143 : vector<8x128xf32>
    %145 = arith.mulf %140, %144 : vector<8x128xf32>
    %146 = arith.index_cast %116 : i32 to index
    %c0_45 = arith.constant 0 : index
    %147 = vector.load %arg17[%146, %c0_45] : memref<32x128xf32, #tpu.memory_space<vmem>>, vector<8x128xf32>
    tpu.vector_store %arg17[%146, %c0_45], %145 {strides = array<i32>} : memref<32x128xf32, #tpu.memory_space<vmem>>, vector<8x128xf32>,
    %c4_i32 = arith.constant 4 : i32
    %c0_46 = arith.constant 0 : index
    %c0_47 = arith.constant 0 : index
    %148 = vector.load %arg14[%c0_46, %c0_47] : memref<8x128xf32, #tpu.memory_space<vmem>>, vector<8x128xf32>
    tpu.vector_store %arg14[%c0_46, %c0_47], %145 {strides = array<i32>} : memref<8x128xf32, #tpu.memory_space<vmem>>, vector<8x128xf32>,
    %c0_48 = arith.constant 0 : index
    %c0_49 = arith.constant 0 : index
    %149 = vector.load %arg15[%c0_48, %c0_49] : memref<8x128xf32, #tpu.memory_space<vmem>>, vector<8x128xf32>
    tpu.vector_store %arg15[%c0_48, %c0_49], %143 {strides = array<i32>} : memref<8x128xf32, #tpu.memory_space<vmem>>, vector<8x128xf32>,
    %c0_50 = arith.constant 0 : index
    %c0_51 = arith.constant 0 : index
    %150 = vector.load %arg17[%c0_50, %c0_51] : memref<32x128xf32, #tpu.memory_space<vmem>>, vector<32x128xf32>
    %c0_52 = arith.constant 0 : index
    %c0_53 = arith.constant 0 : index
    %151 = vector.load %arg7[%c0_52, %c0_53] : memref<128x128xf32, #tpu.memory_space<vmem>>, vector<128x128xf32>
    %cst_54 = arith.constant dense<0.000000e+00> : vector<32x128xf32>
    %152 = tpu.matmul %150, %151, %cst_54 {dimension_numbers = #tpu.dot_dimension_numbers<[1], [0], [0], [1], [0, 0, 1, 1], [], []>} : vector<32x128xf32>, vector<128x128xf32>, vector<32x128xf32> -> vector<32x128xf32>
    %c0_55 = arith.constant 0 : index
    %c0_56 = arith.constant 0 : index
    %153 = vector.load %arg8[%c0_55, %c0_56] : memref<1x128xf32, #tpu.memory_space<vmem>>, vector<1x128xf32>
    %154 = vector.broadcast %153 : vector<1x128xf32> to vector<32x128xf32>
    %155 = arith.addf %152, %154 : vector<32x128xf32>
    %c0_57 = arith.constant 0 : index
    %c0_58 = arith.constant 0 : index
    %c0_59 = arith.constant 0 : index
    %156 = vector.load %arg11[%c0_57, %c0_58, %c0_59] : memref<1x32x128xf32, #tpu.memory_space<vmem>>, vector<1x32x128xf32>
    %157 = vector.shape_cast %156 : vector<1x32x128xf32> to vector<32x128xf32>
    %158 = vector.shape_cast %155 : vector<32x128xf32> to vector<1x32x128xf32>
    tpu.vector_store %arg11[%c0_57, %c0_58, %c0_59], %158 {strides = array<i32>} : memref<1x32x128xf32, #tpu.memory_space<vmem>>, vector<1x32x128xf32>,
    %c1_i32_60 = arith.constant 1 : i32
    %159 = arith.cmpi eq, %arg1, %c1_i32_60 : i32
    %160 = arith.extui %159 : i1 to i32
    %c0_i32_61 = arith.constant 0 : i32
    %161 = arith.cmpi ne, %160, %c0_i32_61 : i32
    scf.if %161 {
      %c0_62 = arith.constant 0 : index
      %c0_63 = arith.constant 0 : index
      %c0_64 = arith.constant 0 : index
      %162 = vector.load %arg12[%c0_62, %c0_63, %c0_64] : memref<1x8x128xf32, #tpu.memory_space<vmem>>, vector<1x8x128xf32>
      %163 = vector.shape_cast %162 : vector<1x8x128xf32> to vector<8x128xf32>
      %164 = vector.shape_cast %145 : vector<8x128xf32> to vector<1x8x128xf32>
      tpu.vector_store %arg12[%c0_62, %c0_63, %c0_64], %164 {strides = array<i32>} : memref<1x8x128xf32, #tpu.memory_space<vmem>>, vector<1x8x128xf32>,
      %c0_65 = arith.constant 0 : index
      %c0_66 = arith.constant 0 : index
      %c0_67 = arith.constant 0 : index
      %165 = vector.load %arg13[%c0_65, %c0_66, %c0_67] : memref<1x8x128xf32, #tpu.memory_space<vmem>>, vector<1x8x128xf32>
      %166 = vector.shape_cast %165 : vector<1x8x128xf32> to vector<8x128xf32>
      %167 = vector.shape_cast %143 : vector<8x128xf32> to vector<1x8x128xf32>
      tpu.vector_store %arg13[%c0_65, %c0_66, %c0_67], %167 {strides = array<i32>} : memref<1x8x128xf32, #tpu.memory_space<vmem>>, vector<1x8x128xf32>,
    } else {
    }
    return
  }
  func.func @transform_0(%arg0: i32, %arg1: i32) -> (i32, i32, i32) {
    %c0_i32 = arith.constant 0 : i32
    %c0_i32_0 = arith.constant 0 : i32
    return %arg0, %arg1, %c0_i32 : i32, i32, i32
  }
  func.func @transform_1(%arg0: i32, %arg1: i32) -> (i32, i32) {
    %c0_i32 = arith.constant 0 : i32
    %c0_i32_0 = arith.constant 0 : i32
    %c0_i32_1 = arith.constant 0 : i32
    return %c0_i32, %c0_i32_0 : i32, i32
  }
  func.func @transform_2(%arg0: i32, %arg1: i32) -> (i32, i32) {
    %c0_i32 = arith.constant 0 : i32
    %c0_i32_0 = arith.constant 0 : i32
    %c0_i32_1 = arith.constant 0 : i32
    return %c0_i32, %c0_i32_0 : i32, i32
  }
  func.func @transform_3(%arg0: i32, %arg1: i32) -> (i32, i32) {
    %c0_i32 = arith.constant 0 : i32
    %c0_i32_0 = arith.constant 0 : i32
    %c0_i32_1 = arith.constant 0 : i32
    return %c0_i32, %c0_i32_0 : i32, i32
  }
  func.func @transform_4(%arg0: i32, %arg1: i32) -> (i32, i32) {
    %c0_i32 = arith.constant 0 : i32
    %c0_i32_0 = arith.constant 0 : i32
    %c0_i32_1 = arith.constant 0 : i32
    return %c0_i32, %c0_i32_0 : i32, i32
  }
  func.func @transform_5(%arg0: i32, %arg1: i32) -> (i32, i32) {
    %c0_i32 = arith.constant 0 : i32
    %c0_i32_0 = arith.constant 0 : i32
    %c0_i32_1 = arith.constant 0 : i32
    return %c0_i32, %c0_i32_0 : i32, i32
  }
  func.func @transform_6(%arg0: i32, %arg1: i32) -> (i32, i32) {
    %c0_i32 = arith.constant 0 : i32
    %c0_i32_0 = arith.constant 0 : i32
    %c0_i32_1 = arith.constant 0 : i32
    return %c0_i32, %c0_i32_0 : i32, i32
  }
  func.func @transform_7(%arg0: i32, %arg1: i32) -> (i32, i32, i32) {
    %c0_i32 = arith.constant 0 : i32
    %c0_i32_0 = arith.constant 0 : i32
    %c0_i32_1 = arith.constant 0 : i32
    return %arg0, %c0_i32, %c0_i32_0 : i32, i32, i32
  }
  func.func @transform_8(%arg0: i32, %arg1: i32) -> (i32, i32, i32) {
    %c0_i32 = arith.constant 0 : i32
    %c0_i32_0 = arith.constant 0 : i32
    %c0_i32_1 = arith.constant 0 : i32
    return %arg0, %c0_i32, %c0_i32_0 : i32, i32, i32
  }
  func.func @transform_9(%arg0: i32, %arg1: i32) -> (i32, i32, i32) {
    %c0_i32 = arith.constant 0 : i32
    %c0_i32_0 = arith.constant 0 : i32
    return %arg0, %arg1, %c0_i32 : i32, i32, i32
  }
  func.func @transform_10(%arg0: i32, %arg1: i32) -> (i32, i32, i32) {
    %c0_i32 = arith.constant 0 : i32
    %c0_i32_0 = arith.constant 0 : i32
    %c0_i32_1 = arith.constant 0 : i32
    return %arg0, %c0_i32, %c0_i32_0 : i32, i32, i32
  }
  func.func @transform_11(%arg0: i32, %arg1: i32) -> (i32, i32, i32) {
    %c0_i32 = arith.constant 0 : i32
    %c0_i32_0 = arith.constant 0 : i32
    %c0_i32_1 = arith.constant 0 : i32
    return %arg0, %c0_i32, %c0_i32_0 : i32, i32, i32
  }
}

</mosaic_0001>

<bundles_post_ra>
// kernel: tpu_custom_call.1
= control target key start
LH: loop header
LB: loop body
LE: loop exit
PB: predicated region body
PF: predicated region fallthrough
CT: control target
= control target key end

     0   :  { %s3958_s0 = inlined_call_operand.hbm [shape: f32[1,64,32], index: 0, kind: input, shape index: {}]   ;;  %s3959_s1 = inlined_call_operand.hbm [shape: f32[32,16], index: 1, kind: input, shape index: {}]   ;;  %s3960_s2 = inlined_call_operand.hbm [shape: f32[16,512], index: 2, kind: input, shape index: {}]   ;;  %s3961_s3 = inlined_call_operand.hbm [shape: f32[128,512], index: 3, kind: input, shape index: {}]   ;;  %s3962_s4 = inlined_call_operand.hbm [shape: f32[1,512], index: 4, kind: input, shape index: {}]   ;;  %s3963_s5 = inlined_call_operand.hbm [shape: f32[128,128], index: 5, kind: input, shape index: {}]   ;;  %s3964_s6 = inlined_call_operand.hbm [shape: f32[1,128], index: 6, kind: input, shape index: {}]   ;;  %s3965_s7 = inlined_call_operand.hbm [shape: f32[1,8,128], index: 7, kind: input, shape index: {}]   ;;  %s3966_s8 = inlined_call_operand.hbm [shape: f32[1,8,128], index: 8, kind: input, shape index: {}]   ;;  %s3967_s9 = inlined_call_operand.hbm [shape: f32[1,64,128], index: 9, kind: output, shape index: {0}]   ;;  %s3968_s10 = inlined_call_operand.hbm [shape: f32[1,8,128], index: 10, kind: output, shape index: {1}]   ;;  %s3969_s11 = inlined_call_operand.hbm [shape: f32[1,8,128], index: 11, kind: output, shape index: {2}]  }
   0x1   :  { %3987 = sst [smem:[#allocation34_spill]] %s3958_s0 }
   0x2   :  { %3988 = sst [smem:[#allocation35_spill]] %s3959_s1 }
   0x3   :  { %3989 = sst [smem:[#allocation36_spill]] %s3960_s2 }
   0x4   :  { %3990 = sst [smem:[#allocation37_spill]] %s3967_s9 }
   0x5   :  { %3991 = sst [smem:[#allocation38_spill]] %s3968_s10 }
   0x6   :  { %3992 = sst [smem:[#allocation39_spill]] %s3969_s11 }
   0x7   :  { %17 = vsyncpa [#allocation7], 0 }
   0x8   :  { %19 = vsyncpa [#allocation7 + $0x1], 0 }
   0x9   :  { %20 = vsyncpa [#allocation10], 0 }
   0xa   :  { %21 = vsyncpa [#allocation13], 0 }
   0xb   :  { %22 = vsyncpa [#allocation16], 0 }
   0xc   :  { %23 = vsyncpa [#allocation19], 0 }
   0xd   :  { %24 = vsyncpa [#allocation8], 0 }
   0xe   :  { %26 = vsyncpa [#allocation8 + $0x1], 0 }
   0xf   :  { %27 = vsyncpa [#allocation23], 0  ;;  %s3243_s17 = smov 0   ;;  %s3245_s18 = smov 0  }
  0x10   :  { %s3247_s19 = smov 0   ;;  %s3249_s20 = smov 0  }
  0x11   :  { %s3251_s21 = smov 0   ;;  %s3253_s22 = smov 0  }
  0x12 LB: > { %3993 = sst [smem:[#allocation32_spill]] %s3154_s20  ;;  %s3970_s23 = sadd.s32 4294967295, %s3162_s22   ;;  %s3162_s22 = sphi %s3253_s22, %s33_s22   ;;  %s3158_s21 = sphi %s3251_s21, %s4032_s21   ;;  %s3154_s20 = sphi %s3249_s20, %s4031_s20   ;;  %s3150_s19 = sphi %s3247_s19, %s4030_s19   ;;  %s3146_s18 = sphi %s3245_s18, %s4029_s18   ;;  %s3142_s17 = sphi %s3243_s17, %s4028_s17  }
  0x13   : > { %p2048_p0 = scmp.ge.s32.totalorder %s3162_s22, 1  ;;  %p3277_p1 = scmp.eq.s32.totalorder %s3970_s23, 0 }
  0x14   : > { %p336_p2 = scmp.lt.s32.totalorder %s3162_s22, 3  ;;  %s3164_s26 = smov [#allocation9]  }
  0x15   : > { %s3994_s24 = scalar_select %p3277_p1, 1, 0 }
  0x16   : > { %p3282_p3 = pnand %p2048_p0, %p336_p2  ;;  %s348_s27 = sshll.u32 %s3164_s26, 4  ;;  %s349_s27 = int_to_ptr.vmem [resolvable:$true] %s348_s27 }
  0x17   : > { %s3165_s29 = smov [#allocation12]   ;;  %s3998_s1 = sld [smem:[#allocation35_spill]] }
  0x18   : > { %s3995_s25 = scalar_select %p3282_p3, 1, 0 }
  0x19   : > { %p2570_p4 = pneg %p3282_p3  ;;  %s374_s30 = sshll.u32 %s3165_s29, 4  ;;  %s375_s30 = int_to_ptr.vmem [resolvable:$true] %s374_s30 }
  0x1a   : > { %3996 = sst [smem:[#allocation33_spill]] %s3995_s25 }
  0x1b   : > { %p3291_p6 = pnand %p2570_p4, %p3277_p1 }
  0x1d   : > { %s2754_s14 = scalar_lea.hbm %s3998_s1, 512  ;;  %p3303_p8 = pneg %p3291_p6 }
  0x1e   : > { %p2755_p7 = scmp.ne.s32.totalorder %s3998_s1, %s2754_s14  ;;  %p2761_p11 = scmp.lt.u32.totalorder %s2754_s14, %s3998_s1 }
  0x20   : > { %p2757_p9 = pnand %p3303_p8, %p2755_p7 }
  0x22   : > { %p2758_p10 = pneg %p2757_p9 }
  0x24   : > { %p2763_p12 = pnand %p2761_p11, %p2758_p10 }
  0x26   : > { %2766 = shalt.err (!%p2763_p12)
}
  0x27   : > { %s2767_s29 = scalar_lea.vmem %s349_s27, 512  ;;  %p2775_p4 = scmp.lt.s32.totalorder %s349_s27, %s349_s27 }
  0x28   : > { %p2768_p13 = scmp.ne.s32.totalorder %s349_s27, %s2767_s29  ;;  %p2776_p5 = scmp.lt.s32.totalorder %s2767_s29, %s2767_s29 }
  0x2a   : > { %p2770_p0 = pnand %p2768_p13, %p3303_p8  ;;  %p2777_p3 = por %p2776_p5, %p2775_p4 }
  0x2c   : > { %p2771_p2 = pneg %p2770_p0 }
  0x2e   : > { %p2778_p1 = pnand %p2777_p3, %p2771_p2 }
  0x30   : > { %2781 = shalt.err (!%p2778_p1)
}
  0x31   : > { %s3981_s12 = smov 128   ;;  %s3982_s13 = smov 8  }
  0x32   : > { %2573 = dma.hbm_to_vmem [thread:$0]  (!%p3291_p6), %s3998_s1, 512, %s349_s27, [#allocation10], %s3981_s12, %s3981_s12, %s3982_s13  }
  0x33   : > { %s3168_s14 = smov [#allocation15]   ;;  %s2782_s9 = scalar_lea.hbm %s3961_s3, 8192 }
  0x34   : > { %s398_s15 = sshll.u32 %s3168_s14, 4  ;;  %p2783_p1 = scmp.ne.s32.totalorder %s3961_s3, %s2782_s9  ;;  %s399_s15 = int_to_ptr.vmem [resolvable:$true] %s398_s15 }
  0x35   : > { %p2789_p7 = scmp.lt.u32.totalorder %s2782_s9, %s3961_s3 }
  0x36   : > { %p2785_p3 = pnand %p2783_p1, %p3303_p8 }
  0x38   : > { %p2786_p5 = pneg %p2785_p3 }
  0x3a   : > { %p2791_p9 = pnand %p2789_p7, %p2786_p5 }
  0x3c   : > { %2794 = shalt.err (!%p2791_p9)
}
  0x3d   : > { %s2795_s27 = scalar_lea.vmem %s375_s30, 8192  ;;  %p2803_p13 = scmp.lt.s32.totalorder %s375_s30, %s375_s30 }
  0x3e   : > { %p2796_p10 = scmp.ne.s32.totalorder %s375_s30, %s2795_s27  ;;  %p2804_p0 = scmp.lt.s32.totalorder %s2795_s27, %s2795_s27 }
  0x40   : > { %p2798_p11 = pnand %p2796_p10, %p3303_p8  ;;  %p2805_p2 = por %p2804_p0, %p2803_p13 }
  0x42   : > { %p2799_p12 = pneg %p2798_p11 }
  0x44   : > { %p2806_p4 = pnand %p2805_p2, %p2799_p12 }
  0x46   : > { %2809 = shalt.err (!%p2806_p4)
}
  0x47   : > { %s3979_s10 = smov 512   ;;  %s3980_s20 = smov 32  }
  0x48   : > { %2579 = dma.hbm_to_vmem [thread:$0]  (!%p3291_p6), %s3961_s3, 8192, %s375_s30, [#allocation13], %s3979_s10, %s3979_s10, %s3980_s20  }
  0x49   : > { %s2810_s23 = scalar_lea.hbm %s3963_s5, 2048 }
  0x4a   : > { %p2811_p1 = scmp.ne.s32.totalorder %s3963_s5, %s2810_s23  ;;  %p2817_p7 = scmp.lt.u32.totalorder %s2810_s23, %s3963_s5 }
  0x4c   : > { %p2813_p3 = pnand %p2811_p1, %p3303_p8 }
  0x4e   : > { %p2814_p5 = pneg %p2813_p3 }
  0x50   : > { %p2819_p9 = pnand %p2817_p7, %p2814_p5 }
  0x52   : > { %2822 = shalt.err (!%p2819_p9)
}
  0x53   : > { %s2823_s0 = scalar_lea.vmem %s399_s15, 2048  ;;  %p2831_p13 = scmp.lt.s32.totalorder %s399_s15, %s399_s15 }
  0x54   : > { %p2824_p10 = scmp.ne.s32.totalorder %s399_s15, %s2823_s0  ;;  %p2832_p0 = scmp.lt.s32.totalorder %s2823_s0, %s2823_s0 }
  0x56   : > { %p2826_p11 = pnand %p2824_p10, %p3303_p8  ;;  %p2833_p2 = por %p2832_p0, %p2831_p13 }
  0x58   : > { %p2827_p12 = pneg %p2826_p11 }
  0x5a   : > { %p2834_p4 = pnand %p2833_p2, %p2827_p12 }
  0x5c   : > { %2837 = shalt.err (!%p2834_p4)
}
  0x5d   : > { %2585 = dma.hbm_to_vmem [thread:$0]  (!%p3291_p6), %s3963_s5, 2048, %s399_s15, [#allocation16], %s3981_s12, %s3981_s12, %s3982_s13  }
  0x5e   : > { %s3171_s25 = smov [#allocation18]   ;;  %s3172_s23 = smov [#allocation11]  }
  0x5f   : > { %s425_s11 = sshll.u32 %s3171_s25, 4  ;;  %s361_s14 = sshll.u32 %s3172_s23, 4  ;;  %s426_s11 = int_to_ptr.vmem [resolvable:$true] %s425_s11  ;;  %s362_s14 = int_to_ptr.vmem [resolvable:$true] %s361_s14 }
  0x60   : > { %s2838_s27 = scalar_lea.hbm %s3965_s7, 128 }
  0x61   : > { %p2839_p1 = scmp.ne.s32.totalorder %s3965_s7, %s2838_s27  ;;  %p2845_p7 = scmp.lt.u32.totalorder %s2838_s27, %s3965_s7 }
  0x63   : > { %p2841_p3 = pnand %p2839_p1, %p3303_p8 }
  0x65   : > { %p2842_p5 = pneg %p2841_p3 }
  0x67   : > { %p2847_p9 = pnand %p2845_p7, %p2842_p5 }
  0x69   : > { %2850 = shalt.err (!%p2847_p9)
}
  0x6a   : > { %s2851_s15 = scalar_lea.vmem %s426_s11, 128  ;;  %p2859_p13 = scmp.lt.s32.totalorder %s426_s11, %s426_s11 }
  0x6b   : > { %p2852_p10 = scmp.ne.s32.totalorder %s426_s11, %s2851_s15  ;;  %p2860_p0 = scmp.lt.s32.totalorder %s2851_s15, %s2851_s15 }
  0x6d   : > { %p2854_p11 = pnand %p2852_p10, %p3303_p8  ;;  %p2861_p2 = por %p2860_p0, %p2859_p13 }
  0x6f   : > { %p2855_p12 = pneg %p2854_p11 }
  0x71   : > { %p2862_p4 = pnand %p2861_p2, %p2855_p12 }
  0x73   : > { %2865 = shalt.err (!%p2862_p4)
}
  0x74   : > { %2591 = dma.hbm_to_vmem [thread:$0]  (!%p3291_p6), %s3965_s7, 128, %s426_s11, [#allocation19]  }
  0x75   : > { %s4000_s2 = sld [smem:[#allocation36_spill]] }
  0x7b   : > { %s2866_s23 = scalar_lea.hbm %s4000_s2, 1024 }
  0x7c   : > { %p2867_p1 = scmp.ne.s32.totalorder %s4000_s2, %s2866_s23  ;;  %p2873_p7 = scmp.lt.u32.totalorder %s2866_s23, %s4000_s2 }
  0x7e   : > { %p2869_p3 = pnand %p2867_p1, %p3303_p8 }
  0x80   : > { %p2870_p5 = pneg %p2869_p3 }
  0x82   : > { %p2875_p9 = pnand %p2873_p7, %p2870_p5 }
  0x84   : > { %2878 = shalt.err (!%p2875_p9)
}
  0x85   : > { %s2879_s30 = scalar_lea.vmem %s362_s14, 1024  ;;  %p2887_p13 = scmp.lt.s32.totalorder %s362_s14, %s362_s14 }
  0x86   : > { %p2880_p10 = scmp.ne.s32.totalorder %s362_s14, %s2879_s30  ;;  %p2888_p0 = scmp.lt.s32.totalorder %s2879_s30, %s2879_s30 }
  0x88   : > { %p2882_p11 = pnand %p2880_p10, %p3303_p8  ;;  %p2889_p2 = por %p2888_p0, %p2887_p13 }
  0x8a   : > { %p2883_p12 = pneg %p2882_p11 }
  0x8c   : > { %p2890_p4 = pnand %p2889_p2, %p2883_p12 }
  0x8e   : > { %2893 = shalt.err (!%p2890_p4)
}
  0x8f   : > { %s4001_s11 = smov 32   ;;  %s4002_s15 = smov 512  }
  0x90   : > { %2576 = dma.hbm_to_vmem [thread:$0]  (!%p3291_p6), %s4000_s2, 1024, %s362_s14, [#allocation10], %s4002_s15, %s4002_s15, %s4001_s11  }
  0x91   : > { %s3173_s20 = smov [#allocation14]   ;;  %s3174_s23 = smov [#allocation17]  }
  0x92   : > { %s388_s25 = sshll.u32 %s3173_s20, 4  ;;  %s412_s16 = sshll.u32 %s3174_s23, 4  ;;  %s389_s25 = int_to_ptr.vmem [resolvable:$true] %s388_s25  ;;  %s413_s16 = int_to_ptr.vmem [resolvable:$true] %s412_s16 }
  0x93   : > { %s2894_s0 = scalar_lea.hbm %s3962_s4, 64 }
  0x94   : > { %p2895_p1 = scmp.ne.s32.totalorder %s3962_s4, %s2894_s0  ;;  %p2901_p7 = scmp.lt.u32.totalorder %s2894_s0, %s3962_s4 }
  0x96   : > { %p2897_p3 = pnand %p2895_p1, %p3303_p8 }
  0x98   : > { %p2898_p5 = pneg %p2897_p3 }
  0x9a   : > { %p2903_p9 = pnand %p2901_p7, %p2898_p5 }
  0x9c   : > { %2906 = shalt.err (!%p2903_p9)
}
  0x9d   : > { %s2907_s14 = scalar_lea.vmem %s389_s25, 64  ;;  %p2915_p13 = scmp.lt.s32.totalorder %s389_s25, %s389_s25 }
  0x9e   : > { %p2908_p10 = scmp.ne.s32.totalorder %s389_s25, %s2907_s14  ;;  %p2916_p0 = scmp.lt.s32.totalorder %s2907_s14, %s2907_s14 }
  0xa0   : > { %p2910_p11 = pnand %p2908_p10, %p3303_p8  ;;  %p2917_p2 = por %p2916_p0, %p2915_p13 }
  0xa2   : > { %p2911_p12 = pneg %p2910_p11 }
  0xa4   : > { %p2918_p4 = pnand %p2917_p2, %p2911_p12 }
  0xa6   : > { %2921 = shalt.err (!%p2918_p4)
}
  0xa7   : > { %2582 = dma.hbm_to_vmem [thread:$0]  (!%p3291_p6), %s3962_s4, 64, %s389_s25, [#allocation13]  }
  0xa8   : > { %s2922_s9 = scalar_lea.hbm %s3964_s6, 16 }
  0xa9   : > { %p2923_p1 = scmp.ne.s32.totalorder %s3964_s6, %s2922_s9  ;;  %p2929_p7 = scmp.lt.u32.totalorder %s2922_s9, %s3964_s6 }
  0xab   : > { %p2925_p3 = pnand %p2923_p1, %p3303_p8 }
  0xad   : > { %p2926_p5 = pneg %p2925_p3 }
  0xaf   : > { %p2931_p9 = pnand %p2929_p7, %p2926_p5 }
  0xb1   : > { %2934 = shalt.err (!%p2931_p9)
}
  0xb2   : > { %s2935_s0 = scalar_lea.vmem %s413_s16, 16  ;;  %s2942_s25 = scalar_lea.vmem %s413_s16, 32 }
  0xb3   : > { %p2936_p10 = scmp.ne.s32.totalorder %s413_s16, %s2935_s0  ;;  %p2943_p13 = scmp.lt.s32.totalorder %s413_s16, %s413_s16 }
  0xb4   : > { %p2944_p0 = scmp.lt.s32.totalorder %s2942_s25, %s2935_s0 }
  0xb5   : > { %p2938_p11 = pnand %p2936_p10, %p3303_p8 }
  0xb6   : > { %p2945_p2 = por %p2944_p0, %p2943_p13 }
  0xb7   : > { %p2939_p12 = pneg %p2938_p11 }
  0xb9   : > { %p2946_p4 = pnand %p2945_p2, %p2939_p12 }
  0xbb   : > { %2949 = shalt.err (!%p2946_p4)
}
  0xbc   : > { %2588 = dma.hbm_to_vmem [thread:$0]  (!%p3291_p6), %s3964_s6, 16, %s413_s16, [#allocation16]  }
  0xbd   : > { %s3175_s14 = smov [#allocation20]   ;;  %s2950_s15 = scalar_lea.hbm %s3966_s8, 128 }
  0xbe   : > { %s438_s12 = sshll.u32 %s3175_s14, 4  ;;  %p2951_p1 = scmp.ne.s32.totalorder %s3966_s8, %s2950_s15  ;;  %s439_s12 = int_to_ptr.vmem [resolvable:$true] %s438_s12 }
  0xbf   : > { %p2957_p7 = scmp.lt.u32.totalorder %s2950_s15, %s3966_s8 }
  0xc0   : > { %p2953_p3 = pnand %p2951_p1, %p3303_p8 }
  0xc2   : > { %p2954_p5 = pneg %p2953_p3 }
  0xc4   : > { %p2959_p9 = pnand %p2957_p7, %p2954_p5 }
  0xc6   : > { %2962 = shalt.err (!%p2959_p9)
}
  0xc7   : > { %s2963_s16 = scalar_lea.vmem %s439_s12, 128  ;;  %p2971_p13 = scmp.lt.s32.totalorder %s439_s12, %s439_s12 }
  0xc8   : > { %p2964_p10 = scmp.ne.s32.totalorder %s439_s12, %s2963_s16  ;;  %p2972_p0 = scmp.lt.s32.totalorder %s2963_s16, %s2963_s16 }
  0xca   : > { %p2966_p11 = pnand %p2964_p10, %p3303_p8  ;;  %p2973_p2 = por %p2972_p0, %p2971_p13 }
  0xcc   : > { %p2967_p12 = pneg %p2966_p11 }
  0xce   : > { %p2974_p4 = pnand %p2973_p2, %p2967_p12 }
  0xd0   : > { %2977 = shalt.err (!%p2974_p4)
}
  0xd1   : > { %2594 = dma.hbm_to_vmem [thread:$0]  (!%p3291_p6), %s3966_s8, 128, %s439_s12, [#allocation19]  }
  0xd2   : > { %s2047_s26 = sadd.s32 4294967294, %s3162_s22   ;;  %s42_s25 = sadd.s32 1, %s3158_s21 }
  0xd3   : > { %p43_p8 = scmp.ge.s32.totalorder %s42_s25, 2  ;;  %s54_s28 = sadd.s32 1, %s3150_s19 }
  0xd4   : > { %p61_p1 = scmp.ne.s32.totalorder %s3150_s19, %s3146_s18  ;;  %p62_p3 = scmp.eq.s32.totalorder %s3162_s22, 0 }
  0xd5   : > { %s4034_s25 = smov (%p43_p8, %s42_s25), 0  ;;  %p67_p7 = scmp.ne.s32.totalorder %s3146_s18, %s3142_s17 }
  0xd6   : > { %p3465_p5 = por %p62_p3, %p61_p1  ;;  %s50_s10 = ssub.s32 %s3158_s21, %s4034_s25 }
  0xd7   : > { %s4004_s14 = sadd.s32 4294967295, %s3162_s22   ;;  %p52_p9 = scmp.eq.s32.totalorder %s50_s10, 0 }
  0xd8   : > { %p3475_p6 = scmp.eq.s32.totalorder %s4004_s14, 1  ;;  %p4006_p10 = scmp.ne.s32.totalorder %s3994_s24, 0 }
  0xd9   : > { %p277_p13 = scmp.eq.s32.totalorder %s2047_s26, 1  ;;  %p2611_p2 = scmp.lt.s32.totalorder %s3162_s22, 2 }
  0xda   : > { %s4005_s12 = scalar_select %p3475_p6, 1, 0 }
  0xdb   : > { %p3481_p11 = por %p4006_p10, %p67_p7  ;;  %p3487_p12 = por %p3475_p6, %p61_p1 }
  0xdc   : > { %s3492_s15 = scalar_select %p52_p9, %s3150_s19, %s54_s28  }
  0xdd   : > { %s4008_s13 = scalar_select %p3487_p12, 1, 0 }
  0xde   : > { %p3494_p0 = por %p277_p13, %p67_p7  ;;  %s449_s20 = sand.u32 1, %s3150_s19  }
  0xdf   : > { %s2108_s23 = sshll.u32 %s3158_s21, 9  ;;  %s2058_s29 = sshll.u32 %s449_s20, 5 }
  0xe0   : > { %s4009_s9 = scalar_select %p3494_p0, 1, 0 }
  0xe1   : > { %s4010_s0 = sld [smem:[#allocation34_spill]]  ;;  %s453_s26 = scalar_lea.vmem [#allocation6], %s2058_s29 }
  0xe2   : > { %s462_s28 = sshll.u32 %s453_s26, 4  ;;  %p3508_p4 = pnand %p2611_p2, %p3465_p5  ;;  %s3512_s28 = int_to_ptr.vmem [resolvable:$true] %s462_s28 }
  0xe3   : > { %s3514_s1 = scalar_lea.sflag [#allocation7], %s449_s20 }
  0xe4   : > { %p2980_p1 = pneg %p3508_p4 }
  0xe7   : > { %s3504_s10 = scalar_lea.hbm %s4010_s0, %s2108_s23  ;;  %s2983_s29 = scalar_lea.hbm %s4010_s0, 1024 }
  0xe8   : > { %s2978_s16 = scalar_lea.hbm %s3504_s10, 512  ;;  %p2984_p5 = scmp.lt.u32.totalorder %s3504_s10, %s4010_s0 }
  0xe9   : > { %p2979_p8 = scmp.ne.s32.totalorder %s3504_s10, %s2978_s16  ;;  %p2985_p9 = scmp.lt.u32.totalorder %s2983_s29, %s2978_s16 }
  0xea   : > { %p2987_p13 = scmp.lt.u32.totalorder %s2978_s16, %s3504_s10 }
  0xeb   : > { %p2981_p3 = pnand %p2980_p1, %p2979_p8  ;;  %p2986_p10 = por %p2985_p9, %p2984_p5 }
  0xed   : > { %p2982_p7 = pneg %p2981_p3  ;;  %p2988_p2 = por %p2987_p13, %p2986_p10 }
  0xef   : > { %p2989_p0 = pnand %p2988_p2, %p2982_p7 }
  0xf1   : > { %2992 = shalt.err (!%p2989_p0)
}
  0xf2   : > { %s2993_s20 = scalar_lea.vmem %s3512_s28, 512  ;;  %s3176_s23 = smov [#allocation6]  }
  0xf3   : > { %p2994_p8 = scmp.ne.s32.totalorder %s3512_s28, %s2993_s20  ;;  %s2998_s30 = sshll.u32 %s3176_s23, 4  ;;  %s2999_s30 = int_to_ptr.vmem [resolvable:$false] %s2998_s30 }
  0xf4   : > { %s3000_s27 = scalar_lea.vmem %s2999_s30, 1024  ;;  %p3001_p6 = scmp.lt.s32.totalorder %s3512_s28, %s2999_s30 }
  0xf5   : > { %p2996_p3 = pnand %p2994_p8, %p2980_p1  ;;  %p3002_p5 = scmp.lt.s32.totalorder %s3000_s27, %s2993_s20 }
  0xf7   : > { %p2997_p12 = pneg %p2996_p3  ;;  %p3003_p9 = por %p3002_p5, %p3001_p6 }
  0xf9   : > { %p3004_p10 = pnand %p3003_p9, %p2997_p12 }
  0xfb   : > { %3007 = shalt.err (!%p3004_p10)
}
  0xfc   : > { %s4012_s16 = smov 8   ;;  %s4013_s29 = smov 128  }
  0xfd   : > { %2598 = dma.hbm_to_vmem [thread:$0]  (!%p3508_p4), %s3504_s10, 512, %s3512_s28, %s3514_s1, %s4013_s29, %s4013_s29, %s4012_s16  }
  0xfe   : > { %s4014_s26 = sld [smem:[#allocation33_spill]] }
 0x104   : > { %p4015_p0 = scmp.ne.s32.totalorder %s4014_s26, 0 }
 0x105   : > { %s3548_s23 = sand.u32 (!%p4015_p0), 1, %s3146_s18  }
 0x106   : > { %474 = sbr.rel (%p4015_p0) target bundleno = 1886 (0x75e), region = 56  ;;  %s2062_s20 = sshll.u32 (!%p4015_p0), %s3548_s23, 5 }
 0x107   : > { %s477_s30 = scalar_lea.sflag (!%p4015_p0), [#allocation7], %s3548_s23  ;;  %s3552_s27 = scalar_lea.vmem (!%p4015_p0), [#allocation6], %s2062_s20 }
 0x10d   : > { %3113 = dma.done.wait (%p3481_p11), %s477_s30, 512  }
 0x10e   : > { %3115 = vsyncadd (%p3481_p11), %s477_s30, 4294966784  ;;  %p4016_p6 = scmp.ne.s32.totalorder %s3994_s24, 0 }
 0x110   : > { %3117 = dma.done.wait (%p4016_p6), [#allocation10], 1536  }
 0x111   : > { %3119 = vsyncadd (%p4016_p6), [#allocation10], 4294965760 }
 0x112   : > { %3121 = dma.done.wait (%p4016_p6), [#allocation13], 8256  }
 0x113   : > { %3123 = vsyncadd (%p4016_p6), [#allocation13], 4294959040 }
 0x114   : > { %3125 = dma.done.wait (%p4016_p6), [#allocation16], 2064  }
 0x115   : > { %3127 = vsyncadd (%p4016_p6), [#allocation16], 4294965232 }
 0x116   : > { %3129 = dma.done.wait (%p4016_p6), [#allocation19], 256  }
 0x117   : > { %3131 = vsyncadd (%p4016_p6), [#allocation19], 4294967040  ;;  %s3574_s1 = scalar_lea.vmem [#allocation21], %s2062_s20  ;;  %s4017_s11 = sld [smem:[#allocation32_spill]] }
 0x11d   : > { %p2072_p11 = scmp.ne.s32.totalorder %s4017_s11, 0 }
 0x11e   : > { %v557_v0 = vld [vmem:[#allocation18] sm:$0xff] (!%p2072_p11)  ;;  %v559_v1 = vld [vmem:[#allocation20] sm:$0xff] (!%p2072_p11) }
 0x11f   : > { %556 = sbr.rel (%p2072_p11) target bundleno = 294 (0x126), region = 96  ;;  %558 = vst [vmem:[#allocation2] sm:$0xff] (!%p2072_p11), %v557_v0  ;;  %560 = vst [vmem:[#allocation3] sm:$0xff] (!%p2072_p11), %v559_v1 }
 0x126 PF: > { %v565_v2 = vld [vmem:[#allocation9] sm:$0xff]  ;;  %v566_v3 = vld [vmem:[#allocation9 + $0x8] sm:$0xff]  ;;  %v567_v4 = vld [vmem:[#allocation9 + $0x10] sm:$0xff]  ;;  %vm569_vm0 = vcmask 261120   ;;  %vm697_vm1 = vcmask 130048   ;;  %s4018_s24 = sld [smem:[#allocation32_spill]] }
 0x127   : > { %v2190_v5 = vpack.c.bf16 %v566_v3, %v565_v2  ;;  %v568_v6 = vld [vmem:[#allocation9 + $0x18] sm:$0xff]  ;;  %v561_v7 = vld [vmem:[%s3552_s27] sm:$0xff]  ;;  %v905_v9 = vld [vmem:[#allocation12 + $0x8] sm:$0xff]  ;;  %v3177_v2 = vmov 0.0  }
 0x128   : > { %v2194_v8 = vpack.c.bf16 %v568_v6, %v567_v4  ;;  %2146 = vmatprep.mubr.msk.f32.mxu0 %vm569_vm0, %v561_v7  ;;  %v909_v10 = vld [vmem:[#allocation12 + $0x28] sm:$0xff]  ;;  %v904_v11 = vld [vmem:[#allocation12] sm:$0xff]  ;;  %v563_v27 = vld [vmem:[%s3552_s27 + $0x10] sm:$0xff]  ;;  %1041 = vmatprep.mubr.f32.mxu1 %v3177_v2 }
 0x129   : > { %2191 = vmatprep.subr.bf16.mxu0 %v2190_v5  ;;  %v908_v12 = vld [vmem:[#allocation12 + $0x20] sm:$0xff]  ;;  %v3579_v13 = vpack.c.bf16 %v909_v10, %v905_v9  ;;  %v913_v15 = vld [vmem:[#allocation12 + $0x48] sm:$0xff]  ;;  %v564_v36 = vld [vmem:[%s3552_s27 + $0x18] sm:$0xff] }
 0x12a   : > { %2193 = vmatpush3.bf16.msra.mxu0 %v2190_v5  ;;  %v3581_v14 = vpack.c.bf16 %v908_v12, %v904_v11  ;;  %v917_v16 = vld [vmem:[#allocation12 + $0x68] sm:$0xff]  ;;  %v912_v17 = vld [vmem:[#allocation12 + $0x40] sm:$0xff]  ;;  %v670_v3 = vld [vmem:[#allocation11 + $0x18] sm:$0xff] }
 0x12b   : > { %2195 = vmatprep.subr.bf16.mxu0 %v2194_v8  ;;  %v3583_v18 = vpack.c.bf16 %v917_v16, %v913_v15  ;;  %v916_v19 = vld [vmem:[#allocation12 + $0x60] sm:$0xff]  ;;  %v921_v20 = vld [vmem:[#allocation12 + $0x88] sm:$0xff]  ;;  %2207 = vmatprep.subr.bf16.mxu1 %v3579_v13  ;;  %v674_v4 = vld [vmem:[#allocation11 + $0x38] sm:$0xff] }
 0x12c   : > { %v925_v21 = vld [vmem:[#allocation12 + $0xa8] sm:$0xff]  ;;  %2209 = vmatpush1.bf16.msra.mxu1 %v3581_v14  ;;  %v3587_v22 = vpack.c.bf16 %v916_v19, %v912_v17  ;;  %v920_v25 = vld [vmem:[#allocation12 + $0x80] sm:$0xff]  ;;  %v2202_v5 = vpack.c.bf16 %v674_v4, %v670_v3  ;;  %v3636_v6 = vld [vmem:[#allocation2] sm:$0xff]  ;;  %p2098_p12 = scmp.ne.s32.totalorder %s4018_s24, 1 }
 0x12d   : > { %v562_v23 = vld [vmem:[%s3552_s27 + $0x8] sm:$0xff]  ;;  %2211 = vmatprep.subr.bf16.mxu1 %v3583_v18  ;;  %v3591_v24 = vpack.c.bf16 %v925_v21, %v921_v20  ;;  %v924_v26 = vld [vmem:[#allocation12 + $0xa0] sm:$0xff]  ;;  %v669_v7 = vld [vmem:[#allocation11 + $0x10] sm:$0xff] }
 0x12e   : > { %2197 = vmatpush3.bf16.msra.mxu0 %v2194_v8  ;;  %v929_v28 = vld [vmem:[#allocation12 + $0xc8] sm:$0xff]  ;;  %v3596_v32 = vpack.c.bf16 %v924_v26, %v920_v25  ;;  %v667_v34 = vld [vmem:[#allocation11] sm:$0xff]  ;;  %v673_v8 = vld [vmem:[#allocation11 + $0x30] sm:$0xff] }
 0x12f   : > { %v933_v29 = vld [vmem:[#allocation12 + $0xe8] sm:$0xff]  ;;  %v671_v35 = vld [vmem:[#allocation11 + $0x20] sm:$0xff]  ;;  %v907_v9 = vld [vmem:[#allocation12 + $0x18] sm:$0xff]  ;;  %v2204_v11 = vpack.c.bf16 %v673_v8, %v669_v7 }
 0x130   : > { %v668_v30 = vld [vmem:[#allocation11 + $0x8] sm:$0xff]  ;;  %2213 = vmatpush1.bf16.msra.mxu1 %v3587_v22  ;;  %v3601_v37 = vpack.c.bf16 %v933_v29, %v929_v28  ;;  %v928_v38 = vld [vmem:[#allocation12 + $0xc0] sm:$0xff]  ;;  %v2200_v40 = vpack.c.bf16 %v671_v35, %v667_v34  ;;  %v911_v10 = vld [vmem:[#allocation12 + $0x38] sm:$0xff] }
 0x131   : > { %v672_v31 = vld [vmem:[#allocation11 + $0x28] sm:$0xff]  ;;  %2147 = vmatmul.mubr.msk.f32.vlgmr.msra.gmra.mrb[0].mxu0 %vm569_vm0, %v562_v23  ;;  %2215 = vmatprep.subr.bf16.mxu1 %v3591_v24  ;;  %v932_v39 = vld [vmem:[#allocation12 + $0xe0] sm:$0xff]  ;;  %v3656_v15 = vpack.c.bf16 %v911_v10, %v907_v9  ;;  %v906_v20 = vld [vmem:[#allocation12 + $0x10] sm:$0xff] }
 0x132   : > { %v2198_v33 = vpack.c.bf16 %v672_v31, %v668_v30  ;;  %2149 = vmatprep.mubr.msk.f32.mxu0 %vm569_vm0, %v563_v27  ;;  %v937_v41 = vld [vmem:[#allocation12 + $0x108] sm:$0xff]  ;;  %v3605_v43 = vpack.c.bf16 %v932_v39, %v928_v38  ;;  %v936_v45 = vld [vmem:[#allocation12 + $0x100] sm:$0xff]  ;;  %v910_v21 = vld [vmem:[#allocation12 + $0x30] sm:$0xff] }
 0x133   : > { %v941_v42 = vld [vmem:[#allocation12 + $0x128] sm:$0xff]  ;;  %v940_v46 = vld [vmem:[#allocation12 + $0x120] sm:$0xff]  ;;  %v915_v23 = vld [vmem:[#allocation12 + $0x58] sm:$0xff]  ;;  %v3667_v26 = vpack.c.bf16 %v910_v21, %v906_v20  ;;  %v677_v21 = vlaneseq }
 0x134   : > { %2199 = vmatprep.subr.bf16.mxu0 %v2198_v33  ;;  %2217 = vmatpush1.bf16.msra.mxu1 %v3596_v32  ;;  %v3608_v44 = vpack.c.bf16 %v941_v42, %v937_v41  ;;  %v945_v47 = vld [vmem:[#allocation12 + $0x148] sm:$0xff]  ;;  %v3611_v49 = vpack.c.bf16 %v940_v46, %v936_v45  ;;  %v944_v51 = vld [vmem:[#allocation12 + $0x140] sm:$0xff]  ;;  %v919_v25 = vld [vmem:[#allocation12 + $0x78] sm:$0xff] }
 0x135   : > { %2201 = vmatpush1.bf16.msra.mxu0 %v2200_v40  ;;  %2219 = vmatprep.subr.bf16.mxu1 %v3601_v37  ;;  %v949_v48 = vld [vmem:[#allocation12 + $0x168] sm:$0xff]  ;;  %v948_v52 = vld [vmem:[#allocation12 + $0x160] sm:$0xff]  ;;  %v3669_v27 = vpack.c.bf16 %v919_v25, %v915_v23  ;;  %v914_v28 = vld [vmem:[#allocation12 + $0x50] sm:$0xff]  ;;  %v678_v23 = vshrl.u32 %v677_v21, 7 }
 0x136   : > { %2150 = vmatmul.mubr.msk.f32.gmra.mrb[2].mxu0 %vm569_vm0, %v564_v36  ;;  %v3614_v50 = vpack.c.bf16 %v949_v48, %v945_v47  ;;  %v953_v53 = vld [vmem:[#allocation12 + $0x188] sm:$0xff]  ;;  %v3617_v55 = vpack.c.bf16 %v948_v52, %v944_v51  ;;  %v952_v57 = vld [vmem:[#allocation12 + $0x180] sm:$0xff]  ;;  %2203 = vmatprep.subr.bf16.mxu0 %v2202_v5  ;;  %v918_v29 = vld [vmem:[#allocation12 + $0x70] sm:$0xff] }
 0x137   : > { %v957_v54 = vld [vmem:[#allocation12 + $0x1a8] sm:$0xff]  ;;  %v956_v58 = vld [vmem:[#allocation12 + $0x1a0] sm:$0xff]  ;;  %774 = vmatprep.mubr.f32.mxu0 %v3177_v2  ;;  %v923_v30 = vld [vmem:[#allocation12 + $0x98] sm:$0xff]  ;;  %v3674_v33 = vpack.c.bf16 %v918_v29, %v914_v28  ;;  %v679_v25 = vsub.s32 0, %v678_v23  ;;  %v683_v29 = vsub.s32 1, %v678_v23 }
 0x138   : > { %2221 = vmatpush1.bf16.msra.mxu1 %v3605_v43  ;;  %v3620_v56 = vpack.c.bf16 %v957_v54, %v953_v53  ;;  %v3623_v59 = vpack.c.bf16 %v956_v58, %v952_v57  ;;  %v961_v60 = vld [vmem:[#allocation12 + $0x1c8] sm:$0xff]  ;;  %v960_v63 = vld [vmem:[#allocation12 + $0x1c0] sm:$0xff]  ;;  %v927_v31 = vld [vmem:[#allocation12 + $0xb8] sm:$0xff] }
 0x139   : > { %2223 = vmatprep.subr.bf16.mxu1 %v3608_v44  ;;  %v965_v61 = vld [vmem:[#allocation12 + $0x1e8] sm:$0xff]  ;;  %v964_v0 = vld [vmem:[#allocation12 + $0x1e0] sm:$0xff]  ;;  %v3677_v34 = vpack.c.bf16 %v927_v31, %v923_v30  ;;  %v922_v35 = vld [vmem:[#allocation12 + $0x90] sm:$0xff] }
 0x13a   : > { %v3627_v62 = vpack.c.bf16 %v965_v61, %v961_v60  ;;  %v3629_v1 = vpack.c.bf16 %v964_v0, %v960_v63  ;;  %v926_v36 = vld [vmem:[#allocation12 + $0xb0] sm:$0xff]  ;;  %v931_v38 = vld [vmem:[#allocation12 + $0xd8] sm:$0xff]  ;;  %v675_v28 = vld [vmem:[#allocation14] sm:$0xf] }
 0x13b   : > { %v935_v39 = vld [vmem:[#allocation12 + $0xf8] sm:$0xff]  ;;  %v3682_v40 = vpack.c.bf16 %v926_v36, %v922_v35  ;;  %v930_v42 = vld [vmem:[#allocation12 + $0xd0] sm:$0xff]  ;;  %v680_v30 = vrot.slane %v675_v28, %v679_v25  ;;  %v684_v31 = vrot.slane %v675_v28, %v683_v29 }
 0x13c   : > { %2225 = vmatpush1.bf16.msra.mxu1 %v3611_v49  ;;  %v3685_v41 = vpack.c.bf16 %v935_v39, %v931_v38  ;;  %v934_v45 = vld [vmem:[#allocation12 + $0xf0] sm:$0xff]  ;;  %v939_v46 = vld [vmem:[#allocation12 + $0x118] sm:$0xff] }
 0x13d   : > { %2227 = vmatprep.subr.bf16.mxu1 %v3614_v50  ;;  %v943_v47 = vld [vmem:[#allocation12 + $0x138] sm:$0xff]  ;;  %v3690_v48 = vpack.c.bf16 %v934_v45, %v930_v42  ;;  %v938_v52 = vld [vmem:[#allocation12 + $0x110] sm:$0xff] }
 0x13e   : > { %v3693_v51 = vpack.c.bf16 %v943_v47, %v939_v46  ;;  %v942_v53 = vld [vmem:[#allocation12 + $0x130] sm:$0xff]  ;;  %v947_v54 = vld [vmem:[#allocation12 + $0x158] sm:$0xff] }
 0x13f   : > { %v951_v57 = vld [vmem:[#allocation12 + $0x178] sm:$0xff]  ;;  %v3697_v58 = vpack.c.bf16 %v942_v53, %v938_v52  ;;  %v946_v61 = vld [vmem:[#allocation12 + $0x150] sm:$0xff] }
 0x140   : > { %2229 = vmatpush1.bf16.msra.mxu1 %v3617_v55  ;;  %v3701_v60 = vpack.c.bf16 %v951_v57, %v947_v54  ;;  %v950_v63 = vld [vmem:[#allocation12 + $0x170] sm:$0xff]  ;;  %v955_v0 = vld [vmem:[#allocation12 + $0x198] sm:$0xff] }
 0x141   : > { %2231 = vmatprep.subr.bf16.mxu1 %v3620_v56  ;;  %v959_v3 = vld [vmem:[#allocation12 + $0x1b8] sm:$0xff]  ;;  %v3704_v4 = vpack.c.bf16 %v950_v63, %v946_v61  ;;  %v954_v7 = vld [vmem:[#allocation12 + $0x190] sm:$0xff] }
 0x142   : > { %v3707_v5 = vpack.c.bf16 %v959_v3, %v955_v0  ;;  %v958_v8 = vld [vmem:[#allocation12 + $0x1b0] sm:$0xff]  ;;  %v963_v9 = vld [vmem:[#allocation12 + $0x1d8] sm:$0xff] }
 0x143   : > { %v967_v10 = vld [vmem:[#allocation12 + $0x1f8] sm:$0xff] }
 0x144   : > { %2233 = vmatpush1.bf16.msra.mxu1 %v3623_v59 }
 0x145   : > { %2235 = vmatprep.subr.bf16.mxu1 %v3627_v62 }
 0x148   : > { %2237 = vmatpush1.bf16.msra.mxu1 %v3629_v1 }
 0x149   : > { %2271 = vmatprep.subr.bf16.mxu1 %v3579_v13 }
 0x14b   : > { %1042 = vmatmul.mubr.f32.vlgmr.msra.gmra.mrb[0].mxu1 %v3636_v6 }
 0x14c   : > { %2273 = vmatpush1.bf16.msra.mxu1 %v3581_v14  ;;  %1219 = vmatprep.mubr.f32.mxu1 %v3177_v2 }
 0x14d   : > { %2275 = vmatprep.subr.bf16.mxu1 %v3583_v18 }
 0x150   : > { %2277 = vmatpush1.bf16.msra.mxu1 %v3587_v22 }
 0x151   : > { %2279 = vmatprep.subr.bf16.mxu1 %v3591_v24 }
 0x154   : > { %2281 = vmatpush1.bf16.msra.mxu1 %v3596_v32 }
 0x155   : > { %2283 = vmatprep.subr.bf16.mxu1 %v3601_v37 }
 0x158   : > { %2285 = vmatpush1.bf16.msra.mxu1 %v3605_v43 }
 0x159   : > { %2287 = vmatprep.subr.bf16.mxu1 %v3608_v44 }
 0x15c   : > { %2289 = vmatpush1.bf16.msra.mxu1 %v3611_v49 }
 0x15d   : > { %2291 = vmatprep.subr.bf16.mxu1 %v3614_v50 }
 0x160   : > { %2293 = vmatpush1.bf16.msra.mxu1 %v3617_v55 }
 0x161   : > { %2295 = vmatprep.subr.bf16.mxu1 %v3620_v56 }
 0x164   : > { %2297 = vmatpush1.bf16.msra.mxu1 %v3623_v59 }
 0x165   : > { %2299 = vmatprep.subr.bf16.mxu1 %v3627_v62 }
 0x168   : > { %2301 = vmatpush1.bf16.msra.mxu1 %v3629_v1 }
 0x169   : > { %2335 = vmatprep.subr.bf16.mxu1 %v3579_v13 }
 0x204   : > { %v2148_v12 = vpop.f32.mrb[0].mxu0 }
 0x205   : > { %v648_v16 = vpop.f32.mrb[1].mxu0 }
 0x206   : > { %2077 = vmatmul.mubr.msk.f32.vlgmr.msra.gmra.mrb[4].mxu0 %vm697_vm1, %v648_v16 }
 0x207   : > { %2205 = vmatpush1.bf16.msra.mxu0 %v2204_v11  ;;  %780 = vmatprep.mubr.f32.mxu0 %v3177_v2  ;;  %v3710_v11 = vpack.c.bf16 %v958_v8, %v954_v7 }
 0x208   : > { %2239 = vmatprep.subr.bf16.mxu0 %v3656_v15 }
 0x209   : > { %v2151_v17 = vpop.f32.mrb[2].mxu0 }
 0x20a   : > { %v658_v19 = vpop.f32.mrb[3].mxu0  ;;  %2078 = vmatmul.mubr.msk.f32.gmra.mrb[6].mxu0 %vm697_vm1, %v2148_v12 }
 0x20b   : > { %786 = vmatprep.mubr.f32.mxu0 %v3177_v2 }
 0x20e   : > { %2079 = vmatmul.mubr.msk.f32.gmra.mrb[8].mxu0 %vm697_vm1, %v658_v19 }
 0x20f   : > { %792 = vmatprep.mubr.f32.mxu0 %v3177_v2 }
 0x212   : > { %2080 = vmatmul.mubr.msk.f32.gmra.mrb[10].mxu0 %vm697_vm1, %v2151_v17 }
 0x213   : > { %863 = vmatprep.mubr.f32.mxu0 %v3177_v2 }
 0x216   : > { %2081 = vmatmul.mubr.msk.f32.vlgmr.msra.gmra.mrb[12].mxu0 %vm697_vm1, %v648_v16  ;;  %v962_v16 = vld [vmem:[#allocation12 + $0x1d0] sm:$0xff] }
 0x217   : > { %2241 = vmatpush1.bf16.msra.mxu0 %v3667_v26  ;;  %869 = vmatprep.mubr.f32.mxu0 %v3177_v2 }
 0x218   : > { %2243 = vmatprep.subr.bf16.mxu0 %v3669_v27 }
 0x21a   : > { %2082 = vmatmul.mubr.msk.f32.gmra.mrb[14].mxu0 %vm697_vm1, %v2148_v12  ;;  %v3713_v12 = vpack.c.bf16 %v967_v10, %v963_v9 }
 0x21b   : > { %2245 = vmatpush1.bf16.msra.mxu0 %v3674_v33  ;;  %875 = vmatprep.mubr.f32.mxu0 %v3177_v2 }
 0x21c   : > { %2247 = vmatprep.subr.bf16.mxu0 %v3677_v34 }
 0x21e   : > { %2083 = vmatmul.mubr.msk.f32.gmra.mrb[16].mxu0 %vm697_vm1, %v658_v19 }
 0x21f   : > { %2249 = vmatpush1.bf16.msra.mxu0 %v3682_v40  ;;  %881 = vmatprep.mubr.f32.mxu0 %v3177_v2 }
 0x220   : > { %2251 = vmatprep.subr.bf16.mxu0 %v3685_v41 }
 0x222   : > { %2084 = vmatmul.mubr.msk.f32.gmra.mrb[18].mxu0 %vm697_vm1, %v2151_v17  ;;  %v966_v17 = vld [vmem:[#allocation12 + $0x1f0] sm:$0xff] }
 0x223   : > { %2253 = vmatpush1.bf16.msra.mxu0 %v3690_v48  ;;  %1112 = vmatprep.mubr.f32.mxu0 %v3177_v2  ;;  %v3716_v19 = vpack.c.bf16 %v966_v17, %v962_v16  ;;  %v687_v16 = vsub.s32 2, %v678_v23 }
 0x224   : > { %2255 = vmatprep.subr.bf16.mxu0 %v3693_v51 }
 0x225   : > { %v3751_v25 = vrot.slane %v675_v28, %v687_v16 }
 0x227   : > { %2257 = vmatpush1.bf16.msra.mxu0 %v3697_v58 }
 0x228   : > { %2259 = vmatprep.subr.bf16.mxu0 %v3701_v60 }
 0x22b   : > { %2261 = vmatpush1.bf16.msra.mxu0 %v3704_v4 }
 0x22c   : > { %2263 = vmatprep.subr.bf16.mxu0 %v3707_v5 }
 0x22f   : > { %2265 = vmatpush1.bf16.msra.mxu0 %v3710_v11 }
 0x230   : > { %2267 = vmatprep.subr.bf16.mxu0 %v3713_v12 }
 0x233   : > { %2269 = vmatpush1.bf16.msra.mxu0 %v3716_v19 }
 0x234   : > { %2303 = vmatprep.subr.bf16.mxu0 %v3656_v15 }
 0x236   : > { %1113 = vmatmul.mubr.f32.vlgmr.msra.gmra.mrb[12].mxu0 %v3636_v6  ;;  %v1043_v6 = vpop.f32.mrb[0].mxu1 }
 0x237   : > { %2305 = vmatpush1.bf16.msra.mxu0 %v3667_v26  ;;  %1290 = vmatprep.mubr.f32.mxu0 %v3177_v2  ;;  %v1045_v20 = vpop.f32.mrb[1].mxu1 }
 0x238   : > { %2307 = vmatprep.subr.bf16.mxu0 %v3669_v27 }
 0x23b   : > { %2309 = vmatpush1.bf16.msra.mxu0 %v3674_v33 }
 0x23c   : > { %2311 = vmatprep.subr.bf16.mxu0 %v3677_v34 }
 0x23f   : > { %2313 = vmatpush1.bf16.msra.mxu0 %v3682_v40 }
 0x240   : > { %2315 = vmatprep.subr.bf16.mxu0 %v3685_v41 }
 0x243   : > { %2317 = vmatpush1.bf16.msra.mxu0 %v3690_v48 }
 0x244   : > { %2319 = vmatprep.subr.bf16.mxu0 %v3693_v51 }
 0x247   : > { %2321 = vmatpush1.bf16.msra.mxu0 %v3697_v58 }
 0x248   : > { %2323 = vmatprep.subr.bf16.mxu0 %v3701_v60 }
 0x24b   : > { %2325 = vmatpush1.bf16.msra.mxu0 %v3704_v4 }
 0x24c   : > { %2327 = vmatprep.subr.bf16.mxu0 %v3707_v5 }
 0x24f   : > { %2329 = vmatpush1.bf16.msra.mxu0 %v3710_v11 }
 0x250   : > { %2331 = vmatprep.subr.bf16.mxu0 %v3713_v12 }
 0x253   : > { %2333 = vmatpush1.bf16.msra.mxu0 %v3716_v19 }
 0x254   : > { %2367 = vmatprep.subr.bf16.mxu0 %v3656_v15 }
 0x2d9   : > { %v776_v35 = vpop.f32.mrb[4].mxu0 }
 0x2da   : > { %v777_v36 = vadd.f32 %v776_v35, %v680_v30  ;;  %v778_v38 = vpop.f32.mrb[5].mxu0 }
 0x2db   : > { %v779_v39 = vadd.f32 %v778_v38, %v684_v31 }
 0x2dc   : > { %v1119_v42 = vadd.f32 %v1043_v6, %v777_v36  ;;  %v691_v6 = vsub.s32 3, %v678_v23  ;;  %v969_v23 = vld [vmem:[#allocation3] sm:$0xff] }
 0x2dd   : > { %v1120_v45 = vadd.f32 %v1045_v20, %v779_v39  ;;  %v782_v46 = vpop.f32.mrb[6].mxu0 }
 0x2de   : > { %v3739_v47 = vadd.f32 %v782_v46, %v680_v30  ;;  %v784_v52 = vpop.f32.mrb[7].mxu0  ;;  %v2085_v10 = vmul.f32 -1.442695, %v1119_v42  ;;  %v3753_v35 = vrot.slane %v675_v28, %v691_v6 }
 0x2df   : > { %v3741_v53 = vadd.f32 %v784_v52, %v684_v31  ;;  %v2086_v9 = vmul.f32 -1.442695, %v1120_v45 }
 0x2e1   : > { %v788_v54 = vpop.f32.mrb[8].mxu0  ;;  %2690 = vpow2.f32 %v2086_v9 }
 0x2e2   : > { %v3743_v57 = vadd.f32 %v788_v54, %v680_v30  ;;  %v790_v61 = vpop.f32.mrb[9].mxu0  ;;  %2692 = vpow2.f32 %v2085_v10 }
 0x2e3   : > { %v3745_v63 = vadd.f32 %v790_v61, %v684_v31 }
 0x2e5   : > { %v794_v0 = vpop.f32.mrb[10].mxu0 }
 0x2e6   : > { %v3747_v3 = vadd.f32 %v794_v0, %v680_v30  ;;  %v796_v7 = vpop.f32.mrb[11].mxu0 }
 0x2e7   : > { %v3749_v8 = vadd.f32 %v796_v7, %v684_v31 }
 0x2eb   : > { %v2691_v17 = vpop.eup %2690 }
 0x2ec   : > { %v2693_v20 = vpop.eup %2692  ;;  %v1132_v21 = vadd.f32 1.0, %v2691_v17 }
 0x2ed   : > { %v1126_v29 = vadd.f32 1.0, %v2693_v20 }
 0x2ee   : > { %2694 = vrcp.f32 %v1132_v21 }
 0x2ef   : > { %2696 = vrcp.f32 %v1126_v29 }
 0x2f8   : > { %v2695_v42 = vpop.eup %2694 }
 0x2f9   : > { %v2697_v45 = vpop.eup %2696  ;;  %v1142_v52 = vmul.f32 %v2695_v42, %v969_v23 }
 0x309   : > { %v1114_v36 = vpop.f32.mrb[12].mxu0 }
 0x30a   : > { %v2510_v30 = vadd.f32 %v1114_v36, %v3751_v25  ;;  %v1116_v31 = vpop.f32.mrb[13].mxu0 }
 0x30b   : > { %v2511_v38 = vadd.f32 %v1116_v31, %v3753_v35 }
 0x30c   : > { %2698 = vtanh.f32 %v2510_v30 }
 0x30d   : > { %v2087_v39 = vmul.f32 -1.442695, %v2511_v38 }
 0x30f   : > { %2700 = vpow2.f32 %v2087_v39 }
 0x316   : > { %v2699_v46 = vpop.eup %2698 }
 0x317   : > { %v1143_v54 = vmul.f32 %v2699_v46, %v2697_v45 }
 0x319   : > { %v2701_v61 = vpop.eup %2700  ;;  %v3757_v28 = vadd.f32 %v1143_v54, %v1142_v52 }
 0x31a   : > { %v1139_v0 = vadd.f32 1.0, %v2701_v61 }
 0x31b   : > { %2702 = vtanh.f32 %v3757_v28 }
 0x31c   : > { %2704 = vrcp.f32 %v1139_v0 }
 0x325   : > { %v2703_v7 = vpop.eup %2702 }
 0x326   : > { %v2705_v9 = vpop.eup %2704 }
 0x327   : > { %v3760_v10 = vmul.f32 %v2705_v9, %v2703_v7 }
 0x329   : > { %1220 = vmatmul.mubr.f32.vlgmr.msra.gmra.mrb[2].mxu1 %v3760_v10  ;;  %1291 = vmatmul.mubr.f32.vlgmr.msra.gmra.mrb[14].mxu0 %v3760_v10 }
 0x32a   : > { %2337 = vmatpush1.bf16.msra.mxu1 %v3581_v14  ;;  %2369 = vmatpush1.bf16.msra.mxu0 %v3667_v26 }
 0x32b   : > { %2339 = vmatprep.subr.bf16.mxu1 %v3583_v18  ;;  %2371 = vmatprep.subr.bf16.mxu0 %v3669_v27 }
 0x32c   : > { %1398 = vmatprep.mubr.f32.mxu1 %v3177_v2  ;;  %1469 = vmatprep.mubr.f32.mxu0 %v3177_v2 }
 0x32e   : > { %2341 = vmatpush1.bf16.msra.mxu1 %v3587_v22  ;;  %2373 = vmatpush1.bf16.msra.mxu0 %v3674_v33 }
 0x32f   : > { %2343 = vmatprep.subr.bf16.mxu1 %v3591_v24  ;;  %2375 = vmatprep.subr.bf16.mxu0 %v3677_v34 }
 0x332   : > { %2345 = vmatpush1.bf16.msra.mxu1 %v3596_v32  ;;  %2377 = vmatpush1.bf16.msra.mxu0 %v3682_v40 }
 0x333   : > { %2347 = vmatprep.subr.bf16.mxu1 %v3601_v37  ;;  %2379 = vmatprep.subr.bf16.mxu0 %v3685_v41 }
 0x336   : > { %2349 = vmatpush1.bf16.msra.mxu1 %v3605_v43  ;;  %2381 = vmatpush1.bf16.msra.mxu0 %v3690_v48 }
 0x337   : > { %2351 = vmatprep.subr.bf16.mxu1 %v3608_v44  ;;  %2383 = vmatprep.subr.bf16.mxu0 %v3693_v51 }
 0x33a   : > { %2353 = vmatpush1.bf16.msra.mxu1 %v3611_v49  ;;  %2385 = vmatpush1.bf16.msra.mxu0 %v3697_v58 }
 0x33b   : > { %2355 = vmatprep.subr.bf16.mxu1 %v3614_v50  ;;  %2387 = vmatprep.subr.bf16.mxu0 %v3701_v60 }
 0x33e   : > { %2357 = vmatpush1.bf16.msra.mxu1 %v3617_v55  ;;  %2389 = vmatpush1.bf16.msra.mxu0 %v3704_v4 }
 0x33f   : > { %2359 = vmatprep.subr.bf16.mxu1 %v3620_v56  ;;  %2391 = vmatprep.subr.bf16.mxu0 %v3707_v5 }
 0x342   : > { %2361 = vmatpush1.bf16.msra.mxu1 %v3623_v59  ;;  %2393 = vmatpush1.bf16.msra.mxu0 %v3710_v11 }
 0x343   : > { %2363 = vmatprep.subr.bf16.mxu1 %v3627_v62  ;;  %2395 = vmatprep.subr.bf16.mxu0 %v3713_v12 }
 0x346   : > { %2365 = vmatpush1.bf16.msra.mxu1 %v3629_v1  ;;  %2397 = vmatpush1.bf16.msra.mxu0 %v3716_v19 }
 0x347   : > { %2399 = vmatprep.subr.bf16.mxu1 %v3579_v13  ;;  %2431 = vmatprep.subr.bf16.mxu0 %v3656_v15 }
 0x3fc   : > { %v1221_v16 = vpop.f32.mrb[2].mxu1  ;;  %v1292_v17 = vpop.f32.mrb[14].mxu0 }
 0x3fd   : > { %v1297_v6 = vadd.f32 %v1221_v16, %v3739_v47  ;;  %v1223_v20 = vpop.f32.mrb[3].mxu1  ;;  %v1294_v21 = vpop.f32.mrb[15].mxu0  ;;  %v2512_v39 = vadd.f32 %v1292_v17, %v3751_v25 }
 0x3fe   : > { %v1298_v29 = vadd.f32 %v1223_v20, %v3741_v53  ;;  %v2513_v31 = vadd.f32 %v1294_v21, %v3753_v35  ;;  %v1698_v20 = vld [vmem:[#allocation15 + $0x38] sm:$0xff] }
 0x3ff   : > { %v2088_v36 = vmul.f32 -1.442695, %v1297_v6  ;;  %v1697_v6 = vld [vmem:[#allocation15 + $0x30] sm:$0xff] }
 0x400   : > { %v2089_v30 = vmul.f32 -1.442695, %v1298_v29  ;;  %v2090_v38 = vmul.f32 -1.442695, %v2513_v31  ;;  %v2474_v21 = vpack.c.bf16 %v1698_v20, %v1697_v6  ;;  %v1699_v29 = vld [vmem:[#allocation15 + $0x40] sm:$0xff]  ;;  %v1701_v31 = vld [vmem:[#allocation15 + $0x50] sm:$0xff] }
 0x401   : > { %2706 = vpow2.f32 %v2088_v36  ;;  %v1700_v36 = vld [vmem:[#allocation15 + $0x48] sm:$0xff] }
 0x402   : > { %2708 = vpow2.f32 %v2089_v30  ;;  %v2478_v30 = vpack.c.bf16 %v1700_v36, %v1699_v29 }
 0x403   : > { %2710 = vpow2.f32 %v2090_v38  ;;  %v1702_v38 = vld [vmem:[#allocation15 + $0x58] sm:$0xff] }
 0x404   : > { %2712 = vtanh.f32 %v2512_v39  ;;  %v2482_v39 = vpack.c.bf16 %v1702_v38, %v1701_v31 }
 0x40b   : > { %v2707_v13 = vpop.eup %2706 }
 0x40c   : > { %v2709_v42 = vpop.eup %2708  ;;  %v1304_v15 = vadd.f32 1.0, %v2707_v13  ;;  %v1703_v13 = vld [vmem:[#allocation15 + $0x60] sm:$0xff] }
 0x40d   : > { %v1310_v23 = vadd.f32 1.0, %v2709_v42  ;;  %v2711_v47 = vpop.eup %2710  ;;  %v1704_v42 = vld [vmem:[#allocation15 + $0x68] sm:$0xff] }
 0x40e   : > { %2714 = vrcp.f32 %v1304_v15  ;;  %v2713_v45 = vpop.eup %2712  ;;  %v1317_v54 = vadd.f32 1.0, %v2711_v47  ;;  %v1705_v15 = vld [vmem:[#allocation15 + $0x70] sm:$0xff] }
 0x40f   : > { %2716 = vrcp.f32 %v1310_v23  ;;  %v1706_v23 = vld [vmem:[#allocation15 + $0x78] sm:$0xff] }
 0x410   : > { %2718 = vrcp.f32 %v1317_v54  ;;  %v2490_v47 = vpack.c.bf16 %v1706_v23, %v1705_v15 }
 0x418   : > { %v2715_v53 = vpop.eup %2714 }
 0x419   : > { %v2717_v46 = vpop.eup %2716  ;;  %v1321_v52 = vmul.f32 %v2715_v53, %v2713_v45 }
 0x41a   : > { %v1320_v61 = vmul.f32 %v2717_v46, %v3757_v28  ;;  %v2719_v7 = vpop.eup %2718  ;;  %v1696_v28 = vld [vmem:[#allocation15 + $0x28] sm:$0xff] }
 0x41c   : > { %v3803_v0 = vadd.f32 %v1321_v52, %v1320_v61 }
 0x41e   : > { %2720 = vtanh.f32 %v3803_v0 }
 0x428   : > { %v2721_v9 = vpop.eup %2720 }
 0x429   : > { %v3806_v16 = vmul.f32 %v2721_v9, %v2719_v7 }
 0x42b   : > { %1399 = vmatmul.mubr.f32.vlgmr.msra.gmra.mrb[4].mxu1 %v3806_v16  ;;  %1470 = vmatmul.mubr.f32.vlgmr.msra.gmra.mrb[16].mxu0 %v3806_v16 }
 0x42c   : > { %2401 = vmatpush1.bf16.msra.mxu1 %v3581_v14  ;;  %2433 = vmatpush1.bf16.msra.mxu0 %v3667_v26  ;;  %v1691_v14 = vld [vmem:[#allocation15] sm:$0xff] }
 0x42d   : > { %2403 = vmatprep.subr.bf16.mxu1 %v3583_v18  ;;  %2435 = vmatprep.subr.bf16.mxu0 %v3669_v27  ;;  %v1692_v18 = vld [vmem:[#allocation15 + $0x8] sm:$0xff] }
 0x42e   : > { %1577 = vmatprep.mubr.f32.mxu1 %v3177_v2  ;;  %1648 = vmatprep.mubr.f32.mxu0 %v3177_v2 }
 0x430   : > { %2405 = vmatpush1.bf16.msra.mxu1 %v3587_v22  ;;  %2437 = vmatpush1.bf16.msra.mxu0 %v3674_v33  ;;  %v2462_v22 = vpack.c.bf16 %v1692_v18, %v1691_v14 }
 0x431   : > { %2407 = vmatprep.subr.bf16.mxu1 %v3591_v24  ;;  %2439 = vmatprep.subr.bf16.mxu0 %v3677_v34 }
 0x434   : > { %2409 = vmatpush1.bf16.msra.mxu1 %v3596_v32  ;;  %2441 = vmatpush1.bf16.msra.mxu0 %v3682_v40 }
 0x435   : > { %2411 = vmatprep.subr.bf16.mxu1 %v3601_v37  ;;  %2443 = vmatprep.subr.bf16.mxu0 %v3685_v41 }
 0x438   : > { %2413 = vmatpush1.bf16.msra.mxu1 %v3605_v43  ;;  %2445 = vmatpush1.bf16.msra.mxu0 %v3690_v48 }
 0x439   : > { %2415 = vmatprep.subr.bf16.mxu1 %v3608_v44  ;;  %2447 = vmatprep.subr.bf16.mxu0 %v3693_v51 }
 0x43c   : > { %2417 = vmatpush1.bf16.msra.mxu1 %v3611_v49  ;;  %2449 = vmatpush1.bf16.msra.mxu0 %v3697_v58 }
 0x43d   : > { %2419 = vmatprep.subr.bf16.mxu1 %v3614_v50  ;;  %2451 = vmatprep.subr.bf16.mxu0 %v3701_v60 }
 0x440   : > { %2421 = vmatpush1.bf16.msra.mxu1 %v3617_v55  ;;  %2453 = vmatpush1.bf16.msra.mxu0 %v3704_v4  ;;  %v1693_v4 = vld [vmem:[#allocation15 + $0x10] sm:$0xff] }
 0x441   : > { %2423 = vmatprep.subr.bf16.mxu1 %v3620_v56  ;;  %2455 = vmatprep.subr.bf16.mxu0 %v3707_v5  ;;  %v1694_v5 = vld [vmem:[#allocation15 + $0x18] sm:$0xff] }
 0x444   : > { %2425 = vmatpush1.bf16.msra.mxu1 %v3623_v59  ;;  %2457 = vmatpush1.bf16.msra.mxu0 %v3710_v11 }
 0x445   : > { %2427 = vmatprep.subr.bf16.mxu1 %v3627_v62  ;;  %2459 = vmatprep.subr.bf16.mxu0 %v3713_v12 }
 0x448   : > { %2429 = vmatpush1.bf16.msra.mxu1 %v3629_v1  ;;  %2461 = vmatpush1.bf16.msra.mxu0 %v3716_v19 }
 0x449   : > { %2463 = vmatprep.subr.bf16.mxu1 %v2462_v22 }
 0x4fe   : > { %v1400_v24 = vpop.f32.mrb[4].mxu1  ;;  %v1471_v32 = vpop.f32.mrb[16].mxu0 }
 0x4ff   : > { %v1476_v37 = vadd.f32 %v1400_v24, %v3743_v57  ;;  %v1402_v43 = vpop.f32.mrb[5].mxu1  ;;  %v1473_v44 = vpop.f32.mrb[17].mxu0  ;;  %v2514_v62 = vadd.f32 %v1471_v32, %v3751_v25  ;;  %v2466_v57 = vpack.c.bf16 %v1694_v5, %v1693_v4 }
 0x500   : > { %v1477_v49 = vadd.f32 %v1402_v43, %v3745_v63  ;;  %v2515_v56 = vadd.f32 %v1473_v44, %v3753_v35  ;;  %v1695_v63 = vld [vmem:[#allocation15 + $0x20] sm:$0xff] }
 0x501   : > { %v2091_v50 = vmul.f32 -1.442695, %v1476_v37  ;;  %v2470_v17 = vpack.c.bf16 %v1696_v28, %v1695_v63 }
 0x502   : > { %v2092_v55 = vmul.f32 -1.442695, %v1477_v49  ;;  %v2093_v59 = vmul.f32 -1.442695, %v2515_v56 }
 0x503   : > { %2722 = vpow2.f32 %v2091_v50  ;;  %v2097_v50 = vld [vmem:[#allocation17] ss:$0 sm:$0xff] }
 0x504   : > { %2724 = vpow2.f32 %v2092_v55 }
 0x505   : > { %2726 = vpow2.f32 %v2093_v59 }
 0x506   : > { %2728 = vtanh.f32 %v2514_v62 }
 0x50d   : > { %v2723_v1 = vpop.eup %2722 }
 0x50e   : > { %v2725_v2 = vpop.eup %2724  ;;  %v1483_v26 = vadd.f32 1.0, %v2723_v1 }
 0x50f   : > { %v1489_v27 = vadd.f32 1.0, %v2725_v2  ;;  %v2727_v33 = vpop.eup %2726 }
 0x510   : > { %2730 = vrcp.f32 %v1483_v26  ;;  %v2729_v34 = vpop.eup %2728  ;;  %v1496_v51 = vadd.f32 1.0, %v2727_v33 }
 0x511   : > { %2732 = vrcp.f32 %v1489_v27 }
 0x512   : > { %2734 = vrcp.f32 %v1496_v51 }
 0x51a   : > { %v2731_v40 = vpop.eup %2730 }
 0x51b   : > { %v2733_v41 = vpop.eup %2732  ;;  %v1500_v48 = vmul.f32 %v2731_v40, %v2729_v34 }
 0x51c   : > { %v1499_v58 = vmul.f32 %v2733_v41, %v3803_v0  ;;  %v2735_v11 = vpop.eup %2734 }
 0x51e   : > { %v3847_v60 = vadd.f32 %v1500_v48, %v1499_v58 }
 0x520   : > { %2736 = vtanh.f32 %v3847_v60 }
 0x52a   : > { %v2737_v12 = vpop.eup %2736 }
 0x52b   : > { %v1503_v19 = vmul.f32 %v2737_v12, %v2735_v11 }
 0x52d   : > { %1578 = vmatmul.mubr.f32.vlgmr.msra.gmra.mrb[6].mxu1 %v1503_v19  ;;  %1649 = vmatmul.mubr.f32.vlgmr.msra.gmra.mrb[18].mxu0 %v1503_v19 }
 0x52e   : > { %2465 = vmatpush3.bf16.msra.mxu1 %v2462_v22  ;;  %2184 = vmatprep.mubr.f32.mxu1 %v3760_v10  ;;  %v2486_v10 = vpack.c.bf16 %v1704_v42, %v1703_v13 }
 0x52f   : > { %2467 = vmatprep.subr.bf16.mxu1 %v2466_v57 }
 0x532   : > { %2469 = vmatpush3.bf16.msra.mxu1 %v2466_v57 }
 0x533   : > { %2471 = vmatprep.subr.bf16.mxu1 %v2470_v17 }
 0x536   : > { %2473 = vmatpush3.bf16.msra.mxu1 %v2470_v17 }
 0x537   : > { %2475 = vmatprep.subr.bf16.mxu1 %v2474_v21 }
 0x53a   : > { %2477 = vmatpush3.bf16.msra.mxu1 %v2474_v21 }
 0x53b   : > { %2479 = vmatprep.subr.bf16.mxu1 %v2478_v30 }
 0x53e   : > { %2481 = vmatpush3.bf16.msra.mxu1 %v2478_v30 }
 0x53f   : > { %2483 = vmatprep.subr.bf16.mxu1 %v2482_v39 }
 0x542   : > { %2485 = vmatpush3.bf16.msra.mxu1 %v2482_v39 }
 0x543   : > { %2487 = vmatprep.subr.bf16.mxu1 %v2486_v10 }
 0x546   : > { %2489 = vmatpush3.bf16.msra.mxu1 %v2486_v10 }
 0x547   : > { %2491 = vmatprep.subr.bf16.mxu1 %v2490_v47 }
 0x54a   : > { %2493 = vmatpush3.bf16.msra.mxu1 %v2490_v47 }
 0x54d   : > { %2185 = vmatmul.mubr.f32.vlgmr.msra.gmra.mrb[8].mxu1 %v3806_v16 }
 0x54e   : > { %2187 = vmatprep.mubr.f32.mxu1 %v1503_v19 }
 0x600   : > { %v1579_v45 = vpop.f32.mrb[6].mxu1  ;;  %v1650_v53 = vpop.f32.mrb[18].mxu0 }
 0x601   : > { %v1655_v46 = vadd.f32 %v1579_v45, %v3747_v3  ;;  %v1581_v52 = vpop.f32.mrb[7].mxu1  ;;  %v1652_v54 = vpop.f32.mrb[19].mxu0  ;;  %v2516_v18 = vadd.f32 %v1650_v53, %v3751_v25 }
 0x602   : > { %v1656_v61 = vadd.f32 %v1581_v52, %v3749_v8  ;;  %v2517_v9 = vadd.f32 %v1652_v54, %v3753_v35 }
 0x603   : > { %v2094_v0 = vmul.f32 -1.442695, %v1655_v46 }
 0x604   : > { %v2095_v7 = vmul.f32 -1.442695, %v1656_v61  ;;  %v2096_v14 = vmul.f32 -1.442695, %v2517_v9 }
 0x605   : > { %2738 = vpow2.f32 %v2094_v0 }
 0x606   : > { %2740 = vpow2.f32 %v2095_v7 }
 0x607   : > { %2742 = vpow2.f32 %v2096_v14 }
 0x608   : > { %2744 = vtanh.f32 %v2516_v18 }
 0x60f   : > { %v2739_v22 = vpop.eup %2738 }
 0x610   : > { %v2741_v16 = vpop.eup %2740  ;;  %v1662_v24 = vadd.f32 1.0, %v2739_v22 }
 0x611   : > { %v1668_v32 = vadd.f32 1.0, %v2741_v16  ;;  %v2743_v3 = vpop.eup %2742 }
 0x612   : > { %2746 = vrcp.f32 %v1662_v24  ;;  %v2745_v8 = vpop.eup %2744  ;;  %v1675_v49 = vadd.f32 1.0, %v2743_v3 }
 0x613   : > { %2748 = vrcp.f32 %v1668_v32 }
 0x614   : > { %2750 = vrcp.f32 %v1675_v49 }
 0x61c   : > { %v2747_v37 = vpop.eup %2746 }
 0x61d   : > { %v2749_v43 = vpop.eup %2748  ;;  %v1679_v44 = vmul.f32 %v2747_v37, %v2745_v8 }
 0x61e   : > { %v1678_v35 = vmul.f32 %v2749_v43, %v3847_v60  ;;  %v2751_v1 = vpop.eup %2750 }
 0x620   : > { %v2186_v25 = vpop.f32.mrb[8].mxu1  ;;  %v1680_v55 = vadd.f32 %v1679_v44, %v1678_v35 }
 0x621   : > { %v1786_v56 = vadd.f32 %v2186_v25, %v2097_v50  ;;  %v1780_v59 = vpop.f32.mrb[9].mxu1 }
 0x622   : > { %v1781_v62 = vadd.f32 %v2097_v50, %v1780_v59  ;;  %2752 = vtanh.f32 %v1680_v55  ;;  %1686 = vst [vmem:[#allocation3] sm:$0xff] %v1680_v55  ;;  %1808 = vst [vmem:[#allocation24] sm:$0xff] (!%p2098_p12), %v1680_v55 }
 0x623   : > { %1800 = vst [vmem:[%s3574_s1 + $0x8] sm:$0xff] %v1786_v56 }
 0x624   : > { %1799 = vst [vmem:[%s3574_s1] sm:$0xff] %v1781_v62 }
 0x62c   : > { %v2753_v2 = vpop.eup %2752 }
 0x62d   : > { %v1682_v26 = vmul.f32 %v2753_v2, %v2751_v1 }
 0x62f   : > { %1685 = vst [vmem:[#allocation2] sm:$0xff] %v1682_v26  ;;  %2188 = vmatmul.mubr.f32.gmra.mrb[10].mxu1 %v1682_v26  ;;  %1807 = vst [vmem:[#allocation22] sm:$0xff] (!%p2098_p12), %v1682_v26 }
 0x700   : > { %1806 = sbr.rel (%p2098_p12) target bundleno = 1799 (0x707), region = 100 }
 0x702   : > { %v2189_v27 = vpop.f32.mrb[10].mxu1 }
 0x703   : > { %v1796_v33 = vadd.f32 %v2189_v27, %v2097_v50  ;;  %v1790_v34 = vpop.f32.mrb[11].mxu1 }
 0x704   : > { %v1791_v40 = vadd.f32 %v2097_v50, %v1790_v34 }
 0x705   : > { %1802 = vst [vmem:[%s3574_s1 + $0x18] sm:$0xff] %v1796_v33 }
 0x706   : > { %1801 = vst [vmem:[%s3574_s1 + $0x10] sm:$0xff] %v1791_v40 }
 0x707 PF: > { %s3178_s10 = smov [#allocation22]   ;;  %s4019_s28 = sld [smem:[#allocation32_spill]] }
 0x708   : > { %s1841_s14 = sshll.u32 %s3178_s10, 4  ;;  %p4020_p1 = scmp.ne.s32.totalorder %s4005_s12, 0  ;;  %s1842_s14 = int_to_ptr.vmem [resolvable:$true] %s1841_s14 }
 0x709   : > { %s3008_s29 = scalar_lea.vmem %s1842_s14, 128  ;;  %p3015_p2 = scmp.lt.s32.totalorder %s1842_s14, %s1842_s14 }
 0x70a   : > { %p3009_p4 = scmp.ne.s32.totalorder %s1842_s14, %s3008_s29  ;;  %p3016_p8 = scmp.lt.s32.totalorder %s3008_s29, %s3008_s29 }
 0x70c   : > { %p3010_p7 = pnand %p3009_p4, %p4020_p1  ;;  %p3017_p3 = por %p3016_p8, %p3015_p2 }
 0x70d   : > { %s2109_s16 = sshll.u32 %s4019_s28, 9 }
 0x70e   : > { %p3011_p13 = pneg %p3010_p7 }
 0x710   : > { %p3018_p5 = pnand %p3017_p3, %p3011_p13 }
 0x712   : > { %3021 = shalt.err (!%p3018_p5)
}
 0x713   : > { %s4021_s30 = sld [smem:[#allocation38_spill]] }
 0x719   : > { %s3022_s27 = scalar_lea.hbm %s4021_s30, 128 }
 0x71a   : > { %p3023_p9 = scmp.ne.s32.totalorder %s4021_s30, %s3022_s27  ;;  %p3028_p6 = scmp.lt.u32.totalorder %s3022_s27, %s4021_s30 }
 0x71c   : > { %p3024_p10 = pnand %p3023_p9, %p4020_p1 }
 0x71e   : > { %p3025_p0 = pneg %p3024_p10 }
 0x720   : > { %p3030_p11 = pnand %p3028_p6, %p3025_p0 }
 0x722   : > { %3033 = shalt.err (!%p3030_p11)
}
 0x723   : > { %2562 = dma.vmem_to_hbm [thread:$0]  (%p4020_p1), %s1842_s14, 128, %s4021_s30, [#allocation23]  }
 0x724   : > { %s4022_s11 = sld [smem:[#allocation37_spill]]  ;;  %s1825_s2 = sshll.u32 %s3574_s1, 4  ;;  %s3887_s2 = int_to_ptr.vmem [resolvable:$true] %s1825_s2 }
 0x725   : > { %s1810_s27 = scalar_lea.sflag [#allocation8], %s3548_s23  ;;  %s3034_s10 = scalar_lea.vmem %s3887_s2, 512 }
 0x726   : > { %p3035_p12 = scmp.ne.s32.totalorder %s3887_s2, %s3034_s10  ;;  %p4023_p4 = scmp.ne.s32.totalorder %s4008_s13, 0 }
 0x727   : > { %s3179_s0 = smov [#allocation21]  }
 0x728   : > { %p3036_p7 = pnand %p3035_p12, %p4023_p4  ;;  %s3038_s28 = sshll.u32 %s3179_s0, 4  ;;  %s3039_s28 = int_to_ptr.vmem [resolvable:$false] %s3038_s28 }
 0x729   : > { %s3040_s14 = scalar_lea.vmem %s3039_s28, 1024  ;;  %p3041_p2 = scmp.lt.s32.totalorder %s3887_s2, %s3039_s28 }
 0x72a   : > { %s3884_s24 = scalar_lea.hbm %s4022_s11, %s2109_s16  ;;  %p3037_p13 = pneg %p3036_p7 }
 0x72b   : > { %p3042_p8 = scmp.lt.s32.totalorder %s3040_s14, %s3034_s10 }
 0x72d   : > { %p3043_p3 = por %p3042_p8, %p3041_p2 }
 0x72f   : > { %p3044_p5 = pnand %p3043_p3, %p3037_p13 }
 0x731   : > { %3047 = shalt.err (!%p3044_p5)
}
 0x732   : > { %s3048_s1 = scalar_lea.hbm %s3884_s24, 512  ;;  %s3052_s26 = scalar_lea.hbm %s4022_s11, 1024 }
 0x733   : > { %p3049_p9 = scmp.ne.s32.totalorder %s3884_s24, %s3048_s1  ;;  %p3053_p6 = scmp.lt.u32.totalorder %s3884_s24, %s4022_s11 }
 0x734   : > { %p3054_p11 = scmp.lt.u32.totalorder %s3052_s26, %s3048_s1  ;;  %p3056_p7 = scmp.lt.u32.totalorder %s3048_s1, %s3884_s24 }
 0x735   : > { %p3050_p10 = pnand %p3049_p9, %p4023_p4 }
 0x736   : > { %p3055_p12 = por %p3054_p11, %p3053_p6 }
 0x737   : > { %p3051_p0 = pneg %p3050_p10 }
 0x738   : > { %p3057_p13 = por %p3056_p7, %p3055_p12 }
 0x73a   : > { %p3058_p2 = pnand %p3057_p13, %p3051_p0 }
 0x73c   : > { %3061 = shalt.err (!%p3058_p2)
}
 0x73d   : > { %s3180_s10 = smov 128   ;;  %s3181_s28 = smov 8  }
 0x73e   : > { %2560 = dma.vmem_to_hbm [thread:$0]  (%p4023_p4), %s3887_s2, 512, %s3884_s24, %s1810_s27, %s3180_s10, %s3180_s10, %s3181_s28  }
 0x73f   : > { %s3182_s14 = smov [#allocation24]  }
 0x740   : > { %s1854_s16 = sshll.u32 %s3182_s14, 4  ;;  %s1855_s16 = int_to_ptr.vmem [resolvable:$true] %s1854_s16 }
 0x741   : > { %s3062_s29 = scalar_lea.vmem %s1855_s16, 128  ;;  %p3069_p9 = scmp.lt.s32.totalorder %s1855_s16, %s1855_s16 }
 0x742   : > { %p3063_p8 = scmp.ne.s32.totalorder %s1855_s16, %s3062_s29  ;;  %p3070_p10 = scmp.lt.s32.totalorder %s3062_s29, %s3062_s29 }
 0x744   : > { %p3064_p3 = pnand %p3063_p8, %p4020_p1  ;;  %p3071_p0 = por %p3070_p10, %p3069_p9 }
 0x746   : > { %p3065_p5 = pneg %p3064_p3 }
 0x748   : > { %p3072_p6 = pnand %p3071_p0, %p3065_p5 }
 0x74a   : > { %3075 = shalt.err (!%p3072_p6)
}
 0x74b   : > { %s4024_s20 = sld [smem:[#allocation39_spill]] }
 0x751   : > { %s4025_s0 = smov %s4024_s20  ;;  %s3076_s13 = scalar_lea.hbm %s4024_s20, 128 }
 0x752   : > { %p3077_p4 = scmp.ne.s32.totalorder %s4025_s0, %s3076_s13  ;;  %p3082_p7 = scmp.lt.u32.totalorder %s3076_s13, %s4025_s0 }
 0x754   : > { %p3078_p11 = pnand %p3077_p4, %p4020_p1 }
 0x756   : > { %p3079_p12 = pneg %p3078_p11 }
 0x758   : > { %p3084_p13 = pnand %p3082_p7, %p3079_p12 }
 0x75a   : > { %3087 = shalt.err (!%p3084_p13)
}
 0x75b   : > { %2564 = dma.vmem_to_hbm [thread:$0]  (%p4020_p1), %s1855_s16, 128, %s4025_s0, [#allocation23]  }
 0x75c   : > { %3133 = dma.done.wait (%p4020_p1), [#allocation23], 256  }
 0x75d   : > { %3135 = vsyncadd (%p4020_p1), [#allocation23], 4294967040 }
 0x75e PF: > { %s1874_s14 = sand.u32 1, %s3142_s17   ;;  %p4026_p2 = scmp.ne.s32.totalorder %s4009_s9, 0 }
 0x75f   : > { %p4027_p8 = scmp.ge.s32.totalorder %s3162_s22, 2  ;;  %s1875_s29 = scalar_lea.sflag [#allocation8], %s1874_s14 }
 0x761   : > { %p2600_p3 = pnand %p4027_p8, %p4026_p2 }
 0x763   : > { %3137 = dma.done.wait (!%p2600_p3), %s1875_s29, 512  }
 0x764   : > { %3139 = vsyncadd (!%p2600_p3), %s1875_s29, 4294966784  ;;  %s33_s22 = sadd.s32 1, %s3162_s22   ;;  %s4028_s17 = smov %s3146_s18 }
 0x765   : > { %p30_p5 = scmp.ge.s32.totalorder %s33_s22, 4   ;;  %s4029_s18 = smov %s3150_s19 }
 0x766   : > { %s4030_s19 = smov %s3492_s15  ;;  %s4031_s20 = smov %s3158_s21 }
 0x767   : > { %s4032_s21 = smov %s4034_s25  ;;  %32 = sbr.rel (!%p30_p5) target bundleno = 18 (0x12), region = 168 }
 0x76e   :  { %1880 = vsyncpa [#allocation7], 1 }
 0x76f   :  { %1882 = vsyncpa [#allocation7 + $0x1], 1 }
 0x770   :  { %1883 = vsyncpa [#allocation10], 1 }
 0x771   :  { %1884 = vsyncpa [#allocation13], 1 }
 0x772   :  { %1885 = vsyncpa [#allocation16], 1 }
 0x773   :  { %1886 = vsyncpa [#allocation19], 1 }
 0x774   :  { %1887 = vsyncpa [#allocation8], 1 }
 0x775   :  { %1889 = vsyncpa [#allocation8 + $0x1], 1 }
 0x776   :  { %1890 = vsyncpa [#allocation23], 1 }

</bundles_post_ra>
